<compile_context>
chip_gen: v7x
topology: tpu7x:2x2x1
jax: 0.10.0
libtpu: 0.0.40
codegen_flags: <defaults>
</compile_context>

<pallas_src>
import functools

import jax
import jax.numpy as jnp
import numpy as np
from jax.experimental import pallas as pl
from jax.experimental.pallas import tpu as pltpu


# ---------------------------------------------------------------------------
# LSTM cell math on the per-step critical path (PyTorch gate order: i, f, g, o)
#   * activations on the full packed (B, 4n) tile first, then slice;
#   * sigmoid(x) = 0.5*(tanh(x/2)+1)  -> one EUP op instead of exp+div.
# ---------------------------------------------------------------------------
def _lstm_cell_fast(gates, c_prev, n):
    s = 0.5 * (jnp.tanh(0.5 * gates) + 1.0)      # sigmoid of packed gates
    t = jnp.tanh(gates)                          # tanh of packed gates
    i = s[:, 0 * n:1 * n]
    f = s[:, 1 * n:2 * n]
    g = t[:, 2 * n:3 * n]
    o = s[:, 3 * n:4 * n]
    c = f * c_prev + i * g
    h = o * jnp.tanh(c)
    return h, c


# ---------------------------------------------------------------------------
# fused kernel: encoder LSTM -> classifier MLP -> decoder LSTM -> fc
# x arrives time-major, batch padded to B (a multiple of 8) and row-flattened:
# rows are [t=0: b0..bB-1, t=1: ..., ...]
# ---------------------------------------------------------------------------
def fused_lstm_ae_kernel(x_ref, ewih_ref, ewhh_ref, eb_ref,
                         dwih_ref, dwhh_ref, db_ref,
                         fcw_ref, fcb_ref,
                         c1w_ref, c1b_ref, c2w_ref, c2b_ref,
                         out_ref, henc_scr, hdec_scr, *, T, B, I):
    E = ewhh_ref.shape[0]
    H = dwhh_ref.shape[0]
    f32 = jnp.float32

    # ----- encoder: hoisted input projection for ALL T steps (one matmul) ----
    xproj = (jnp.dot(x_ref[...], ewih_ref[...], preferred_element_type=f32)
             + eb_ref[...])                                   # (T*B, 4E)

    # TODO(synk): hold ewhh/dwhh in MXU weight registers across the recurrence
    # via pltpu.matmul_push_rhs / matmul_acc_lhs / matmul_pop to shave the
    # per-step weight push; kept jnp.dot for portable f32 lowering on
    # v5e/v6e/v7x.
    ewhh = ewhh_ref[...]
    h = jnp.zeros((B, E), f32)
    c = jnp.zeros((B, E), f32)
    # T is small & static: fully-unrolled recurrence, state stays in vregs,
    # per-step h written once into a tile-aligned VMEM scratch slab.
    # TODO(synk): for long sequences switch to lax.fori_loop and chunk the
    # resident slabs against the smaller (64 MiB) VMEM on v7x.
    for t in range(T):
        gates = xproj[t * B:(t + 1) * B, :] + jnp.dot(
            h, ewhh, preferred_element_type=f32)              # (B, 4E)
        h, c = _lstm_cell_fast(gates, c, E)
        henc_scr[t * B:(t + 1) * B, :] = h                    # aligned 8-row vst

    # ----- classifier MLP, batched; last step's prediction is discarded by ---
    # ----- the wrapper's shift/concat, so only compute the first T-1 steps ---
    henc_head = henc_scr[0:(T - 1) * B, :]                    # ((T-1)*B, E)
    hid = jnp.maximum(
        jnp.dot(henc_head, c1w_ref[...], preferred_element_type=f32)
        + c1b_ref[...], 0.0)
    preds = (jnp.dot(hid, c2w_ref[...], preferred_element_type=f32)
             + c2b_ref[...])                                  # ((T-1)*B, I)

    # ----- decoder: constant input z = last encoder h; zproj loop-invariant --
    zproj = (jnp.dot(h, dwih_ref[...], preferred_element_type=f32)
             + db_ref[...])                                   # (B, 4H)
    dwhh = dwhh_ref[...]
    hd = jnp.zeros((B, H), f32)
    cd = jnp.zeros((B, H), f32)
    for t in range(T):
        gates = zproj + jnp.dot(hd, dwhh, preferred_element_type=f32)
        hd, cd = _lstm_cell_fast(gates, cd, H)
        hdec_scr[t * B:(t + 1) * B, :] = hd                   # aligned 8-row vst

    # ----- decoder fc hoisted out of the loop: one batched matmul ------------
    dec = (jnp.dot(hdec_scr[...], fcw_ref[...], preferred_element_type=f32)
           + fcb_ref[...])                                    # (T*B, I)

    # ----- single fused output slab: columns [dec | preds] -------------------
    out_ref[:, 0:I] = dec.astype(out_ref.dtype)
    out_ref[0:(T - 1) * B, I:2 * I] = preds.astype(out_ref.dtype)
    out_ref[(T - 1) * B:T * B, I:2 * I] = jnp.zeros((B, I), out_ref.dtype)


# ---------------------------------------------------------------------------
# parameter construction (deterministic, PyTorch-style uniform init)
# Weights stored transposed (in, 4*out); the two PyTorch LSTM biases pre-summed.
# ---------------------------------------------------------------------------
def init_params(key, input_size, encoded_size, hidden_size):
    # TODO(synk): num_layers > 1 not implemented; single-layer LSTMs only.
    assert encoded_size == hidden_size, (
        "LSTM_autoencoder is only shape-consistent when encoded_size == hidden_size")
    ks = jax.random.split(key, 14)
    H, E, I = hidden_size, encoded_size, input_size

    def u(k, shape, fan):
        bound = 1.0 / jnp.sqrt(jnp.float32(fan))
        return jax.random.uniform(k, shape, jnp.float32, -bound, bound)

    return {
        # encoder LSTM: nn.LSTM(input_size, encoded_size)
        "enc_wih": u(ks[0], (I, 4 * E), E),
        "enc_whh": u(ks[1], (E, 4 * E), E),
        "enc_b":   u(ks[2], (1, 4 * E), E) + u(ks[3], (1, 4 * E), E),
        # decoder LSTM: nn.LSTM(encoded_size, hidden_size)
        "dec_wih": u(ks[4], (E, 4 * H), H),
        "dec_whh": u(ks[5], (H, 4 * H), H),
        "dec_b":   u(ks[6], (1, 4 * H), H) + u(ks[7], (1, 4 * H), H),
        # fc: Linear(hidden_size, input_size)
        "fc_w":  u(ks[8], (H, I), H),
        "fc_b":  u(ks[9], (1, I), H),
        # fc_classifier1: Linear(hidden_size, encoded_size)
        "cls_w1": u(ks[10], (H, E), H),
        "cls_b1": u(ks[11], (1, E), H),
        # fc_classifier2: Linear(encoded_size, input_size)
        "cls_w2": u(ks[12], (E, I), E),
        "cls_b2": u(ks[13], (1, I), E),
    }


# ---------------------------------------------------------------------------
# full forward (matches LSTM_autoencoder.forward)
# ---------------------------------------------------------------------------
def lstm_autoencoder_forward(params, x):
    """x: (B, T, I) float32, batch_first — matches the PyTorch module."""
    B, T, I = x.shape
    E = params["enc_whh"].shape[0]
    H = params["dec_whh"].shape[0]
    assert E == H, "LSTM_autoencoder requires encoded_size == hidden_size"

    # pad batch to a full f32 sublane tile (8) and flatten time-major:
    # rows [t0: b0..bBP-1, t1: ..., ...]; padded rows are independent garbage.
    BP = ((B + 7) // 8) * 8
    x_tm = jnp.transpose(x, (1, 0, 2))                        # (T, B, I)
    x_tm = jnp.pad(x_tm, ((0, 0), (0, BP - B), (0, 0)))       # (T, BP, I)
    x_flat = x_tm.reshape(T * BP, I)

    out_flat = pl.pallas_call(
        functools.partial(fused_lstm_ae_kernel, T=T, B=BP, I=I),
        out_shape=jax.ShapeDtypeStruct((T * BP, 2 * I), jnp.float32),
        scratch_shapes=[pltpu.VMEM((T * BP, E), jnp.float32),   # henc slab
                        pltpu.VMEM((T * BP, H), jnp.float32)],  # hdec slab
    )(x_flat,
      params["enc_wih"], params["enc_whh"], params["enc_b"],
      params["dec_wih"], params["dec_whh"], params["dec_b"],
      params["fc_w"], params["fc_b"],
      params["cls_w1"], params["cls_b1"],
      params["cls_w2"], params["cls_b2"])

    out = out_flat.reshape(T, BP, 2 * I)[:, :B, :]            # (T, B, 2I)
    decoded = jnp.transpose(out[..., :I], (1, 0, 2))          # (B, T, I)
    preds = jnp.transpose(out[..., I:], (1, 0, 2))            # (B, T, I)
    # torch.cat((x[:, 1, :].unsqueeze(1), predictions[:, :-1, :]), dim=1)
    # NOTE: keeps the module's x[:, 1, :] seed verbatim (suspicious off-by-one
    # in the original, but we preserve its semantics). The dropped last row is
    # the zero-filled/skipped classifier step.
    preds = jnp.concatenate([x[:, 1:2, :], preds[:, :-1, :]], axis=1)
    return decoded, preds


# ---------------------------------------------------------------------------
# pure-JAX reference (no Pallas, standard sigmoid) for a correctness check
# ---------------------------------------------------------------------------
def reference_forward(params, x):
    B, T, I = x.shape
    E = params["enc_whh"].shape[0]
    H = params["dec_whh"].shape[0]

    def cell(x_t, h, c, wih, whh, b, n):
        gates = x_t @ wih + h @ whh + b
        i = jax.nn.sigmoid(gates[:, 0 * n:1 * n])
        f = jax.nn.sigmoid(gates[:, 1 * n:2 * n])
        g = jnp.tanh(gates[:, 2 * n:3 * n])
        o = jax.nn.sigmoid(gates[:, 3 * n:4 * n])
        c = f * c + i * g
        h = o * jnp.tanh(c)
        return h, c

    h = jnp.zeros((B, E), jnp.float32)
    c = jnp.zeros((B, E), jnp.float32)
    enc = []
    for t in range(T):
        h, c = cell(x[:, t, :], h, c, params["enc_wih"], params["enc_whh"],
                    params["enc_b"], E)
        enc.append(h)
    enc = jnp.stack(enc, axis=1)                              # (B, T, E)

    hid = jnp.maximum(enc @ params["cls_w1"] + params["cls_b1"], 0.0)
    preds = hid @ params["cls_w2"] + params["cls_b2"]
    preds = jnp.concatenate([x[:, 1:2, :], preds[:, :-1, :]], axis=1)

    z = enc[:, -1, :]
    hd = jnp.zeros((B, H), jnp.float32)
    cd = jnp.zeros((B, H), jnp.float32)
    dec = []
    for t in range(T):
        hd, cd = cell(z, hd, cd, params["dec_wih"], params["dec_whh"],
                      params["dec_b"], H)
        dec.append(hd @ params["fc_w"] + params["fc_b"])
    dec = jnp.stack(dec, axis=1)                              # (B, T, I)
    return dec, preds


if __name__ == "__main__":
    batch = 2
    seq_len = 8
    input_size = 4
    hidden_size = 32
    encoded_size = hidden_size   # module is only consistent when these match

    key = jax.random.PRNGKey(0)
    k_param, k_x = jax.random.split(key)
    params = init_params(k_param, input_size, encoded_size, hidden_size)
    x = jax.random.normal(k_x, (batch, seq_len, input_size), jnp.float32)

    fwd = jax.jit(lstm_autoencoder_forward)
    decoded, predictions = fwd(params, x)
    jax.block_until_ready((decoded, predictions))

    assert decoded.shape == (batch, seq_len, input_size), decoded.shape
    assert predictions.shape == (batch, seq_len, input_size), predictions.shape

    dec_ref, pred_ref = jax.jit(reference_forward)(params, x)
    np.testing.assert_allclose(np.asarray(decoded), np.asarray(dec_ref),
                               rtol=2e-2, atol=2e-2)
    np.testing.assert_allclose(np.asarray(predictions), np.asarray(pred_ref),
                               rtol=2e-2, atol=2e-2)

    print("KERNEL_OK")
</pallas_src>

<mosaic_0001>
module attributes {stable_mosaic.version = 11 : i64} {
  func.func @fused_lstm_ae_kernel(%arg0: memref<64x4xf32, #tpu.memory_space<vmem>>, %arg1: memref<4x128xf32, #tpu.memory_space<vmem>>, %arg2: memref<32x128xf32, #tpu.memory_space<vmem>>, %arg3: memref<1x128xf32, #tpu.memory_space<vmem>>, %arg4: memref<32x128xf32, #tpu.memory_space<vmem>>, %arg5: memref<32x128xf32, #tpu.memory_space<vmem>>, %arg6: memref<1x128xf32, #tpu.memory_space<vmem>>, %arg7: memref<32x4xf32, #tpu.memory_space<vmem>>, %arg8: memref<1x4xf32, #tpu.memory_space<vmem>>, %arg9: memref<32x32xf32, #tpu.memory_space<vmem>>, %arg10: memref<1x32xf32, #tpu.memory_space<vmem>>, %arg11: memref<32x4xf32, #tpu.memory_space<vmem>>, %arg12: memref<1x4xf32, #tpu.memory_space<vmem>>, %arg13: memref<64x8xf32, #tpu.memory_space<vmem>>, %arg14: memref<64x32xf32, #tpu.memory_space<vmem>>, %arg15: memref<64x32xf32, #tpu.memory_space<vmem>>) attributes {dimension_semantics = [], scalar_prefetch = 0 : i64, scratch_operands = 2 : i64, tpu.core_type = #tpu.core_type<tc>} {
    %c0 = arith.constant 0 : index
    %c0_0 = arith.constant 0 : index
    %0 = vector.load %arg0[%c0, %c0_0] : memref<64x4xf32, #tpu.memory_space<vmem>>, vector<64x4xf32>
    %c0_1 = arith.constant 0 : index
    %c0_2 = arith.constant 0 : index
    %1 = vector.load %arg1[%c0_1, %c0_2] : memref<4x128xf32, #tpu.memory_space<vmem>>, vector<4x128xf32>
    %cst = arith.constant dense<0.000000e+00> : vector<64x128xf32>
    %2 = tpu.matmul %0, %1, %cst {dimension_numbers = #tpu.dot_dimension_numbers<[1], [0], [0], [1], [0, 0, 1, 1], [], []>} : vector<64x4xf32>, vector<4x128xf32>, vector<64x128xf32> -> vector<64x128xf32>
    %c0_3 = arith.constant 0 : index
    %c0_4 = arith.constant 0 : index
    %3 = vector.load %arg3[%c0_3, %c0_4] : memref<1x128xf32, #tpu.memory_space<vmem>>, vector<1x128xf32>
    %4 = vector.broadcast %3 : vector<1x128xf32> to vector<64x128xf32>
    %5 = arith.addf %2, %4 : vector<64x128xf32>
    %c0_5 = arith.constant 0 : index
    %c0_6 = arith.constant 0 : index
    %6 = vector.load %arg2[%c0_5, %c0_6] : memref<32x128xf32, #tpu.memory_space<vmem>>, vector<32x128xf32>
    %cst_7 = arith.constant 0.000000e+00 : f32
    %7 = vector.broadcast %cst_7 : f32 to vector<8x32xf32>
    %cst_8 = arith.constant 0.000000e+00 : f32
    %8 = vector.broadcast %cst_8 : f32 to vector<8x32xf32>
    %9 = vector.extract_strided_slice %5 {offsets = [0, 0], sizes = [8, 128], strides = [1, 1]} : vector<64x128xf32> to vector<8x128xf32>
    %cst_9 = arith.constant dense<0.000000e+00> : vector<8x128xf32>
    %10 = tpu.matmul %7, %6, %cst_9 {dimension_numbers = #tpu.dot_dimension_numbers<[1], [0], [0], [1], [0, 0, 1, 1], [], []>} : vector<8x32xf32>, vector<32x128xf32>, vector<8x128xf32> -> vector<8x128xf32>
    %11 = arith.addf %9, %10 : vector<8x128xf32>
    %cst_10 = arith.constant 5.000000e-01 : f32
    %12 = vector.broadcast %cst_10 : f32 to vector<8x128xf32>
    %13 = arith.mulf %12, %11 : vector<8x128xf32>
    %14 = math.tanh %13 : vector<8x128xf32>
    %cst_11 = arith.constant 1.000000e+00 : f32
    %15 = vector.broadcast %cst_11 : f32 to vector<8x128xf32>
    %16 = arith.addf %14, %15 : vector<8x128xf32>
    %cst_12 = arith.constant 5.000000e-01 : f32
    %17 = vector.broadcast %cst_12 : f32 to vector<8x128xf32>
    %18 = arith.mulf %17, %16 : vector<8x128xf32>
    %19 = math.tanh %11 : vector<8x128xf32>
    %20 = vector.extract_strided_slice %18 {offsets = [0, 0], sizes = [8, 32], strides = [1, 1]} : vector<8x128xf32> to vector<8x32xf32>
    %21 = vector.extract_strided_slice %18 {offsets = [0, 32], sizes = [8, 32], strides = [1, 1]} : vector<8x128xf32> to vector<8x32xf32>
    %22 = vector.extract_strided_slice %19 {offsets = [0, 64], sizes = [8, 32], strides = [1, 1]} : vector<8x128xf32> to vector<8x32xf32>
    %23 = vector.extract_strided_slice %18 {offsets = [0, 96], sizes = [8, 32], strides = [1, 1]} : vector<8x128xf32> to vector<8x32xf32>
    %24 = arith.mulf %21, %8 : vector<8x32xf32>
    %25 = arith.mulf %20, %22 : vector<8x32xf32>
    %26 = arith.addf %24, %25 : vector<8x32xf32>
    %27 = math.tanh %26 : vector<8x32xf32>
    %28 = arith.mulf %23, %27 : vector<8x32xf32>
    %c0_13 = arith.constant 0 : index
    %c0_14 = arith.constant 0 : index
    %29 = vector.load %arg14[%c0_13, %c0_14] : memref<64x32xf32, #tpu.memory_space<vmem>>, vector<8x32xf32>
    tpu.vector_store %arg14[%c0_13, %c0_14], %28 {strides = array<i32>} : memref<64x32xf32, #tpu.memory_space<vmem>>, vector<8x32xf32>,
    %30 = vector.extract_strided_slice %5 {offsets = [8, 0], sizes = [8, 128], strides = [1, 1]} : vector<64x128xf32> to vector<8x128xf32>
    %cst_15 = arith.constant dense<0.000000e+00> : vector<8x128xf32>
    %31 = tpu.matmul %28, %6, %cst_15 {dimension_numbers = #tpu.dot_dimension_numbers<[1], [0], [0], [1], [0, 0, 1, 1], [], []>} : vector<8x32xf32>, vector<32x128xf32>, vector<8x128xf32> -> vector<8x128xf32>
    %32 = arith.addf %30, %31 : vector<8x128xf32>
    %cst_16 = arith.constant 5.000000e-01 : f32
    %33 = vector.broadcast %cst_16 : f32 to vector<8x128xf32>
    %34 = arith.mulf %33, %32 : vector<8x128xf32>
    %35 = math.tanh %34 : vector<8x128xf32>
    %cst_17 = arith.constant 1.000000e+00 : f32
    %36 = vector.broadcast %cst_17 : f32 to vector<8x128xf32>
    %37 = arith.addf %35, %36 : vector<8x128xf32>
    %cst_18 = arith.constant 5.000000e-01 : f32
    %38 = vector.broadcast %cst_18 : f32 to vector<8x128xf32>
    %39 = arith.mulf %38, %37 : vector<8x128xf32>
    %40 = math.tanh %32 : vector<8x128xf32>
    %41 = vector.extract_strided_slice %39 {offsets = [0, 0], sizes = [8, 32], strides = [1, 1]} : vector<8x128xf32> to vector<8x32xf32>
    %42 = vector.extract_strided_slice %39 {offsets = [0, 32], sizes = [8, 32], strides = [1, 1]} : vector<8x128xf32> to vector<8x32xf32>
    %43 = vector.extract_strided_slice %40 {offsets = [0, 64], sizes = [8, 32], strides = [1, 1]} : vector<8x128xf32> to vector<8x32xf32>
    %44 = vector.extract_strided_slice %39 {offsets = [0, 96], sizes = [8, 32], strides = [1, 1]} : vector<8x128xf32> to vector<8x32xf32>
    %45 = arith.mulf %42, %26 : vector<8x32xf32>
    %46 = arith.mulf %41, %43 : vector<8x32xf32>
    %47 = arith.addf %45, %46 : vector<8x32xf32>
    %48 = math.tanh %47 : vector<8x32xf32>
    %49 = arith.mulf %44, %48 : vector<8x32xf32>
    %c8 = arith.constant 8 : index
    %c0_19 = arith.constant 0 : index
    %50 = vector.load %arg14[%c8, %c0_19] : memref<64x32xf32, #tpu.memory_space<vmem>>, vector<8x32xf32>
    tpu.vector_store %arg14[%c8, %c0_19], %49 {strides = array<i32>} : memref<64x32xf32, #tpu.memory_space<vmem>>, vector<8x32xf32>,
    %51 = vector.extract_strided_slice %5 {offsets = [16, 0], sizes = [8, 128], strides = [1, 1]} : vector<64x128xf32> to vector<8x128xf32>
    %cst_20 = arith.constant dense<0.000000e+00> : vector<8x128xf32>
    %52 = tpu.matmul %49, %6, %cst_20 {dimension_numbers = #tpu.dot_dimension_numbers<[1], [0], [0], [1], [0, 0, 1, 1], [], []>} : vector<8x32xf32>, vector<32x128xf32>, vector<8x128xf32> -> vector<8x128xf32>
    %53 = arith.addf %51, %52 : vector<8x128xf32>
    %cst_21 = arith.constant 5.000000e-01 : f32
    %54 = vector.broadcast %cst_21 : f32 to vector<8x128xf32>
    %55 = arith.mulf %54, %53 : vector<8x128xf32>
    %56 = math.tanh %55 : vector<8x128xf32>
    %cst_22 = arith.constant 1.000000e+00 : f32
    %57 = vector.broadcast %cst_22 : f32 to vector<8x128xf32>
    %58 = arith.addf %56, %57 : vector<8x128xf32>
    %cst_23 = arith.constant 5.000000e-01 : f32
    %59 = vector.broadcast %cst_23 : f32 to vector<8x128xf32>
    %60 = arith.mulf %59, %58 : vector<8x128xf32>
    %61 = math.tanh %53 : vector<8x128xf32>
    %62 = vector.extract_strided_slice %60 {offsets = [0, 0], sizes = [8, 32], strides = [1, 1]} : vector<8x128xf32> to vector<8x32xf32>
    %63 = vector.extract_strided_slice %60 {offsets = [0, 32], sizes = [8, 32], strides = [1, 1]} : vector<8x128xf32> to vector<8x32xf32>
    %64 = vector.extract_strided_slice %61 {offsets = [0, 64], sizes = [8, 32], strides = [1, 1]} : vector<8x128xf32> to vector<8x32xf32>
    %65 = vector.extract_strided_slice %60 {offsets = [0, 96], sizes = [8, 32], strides = [1, 1]} : vector<8x128xf32> to vector<8x32xf32>
    %66 = arith.mulf %63, %47 : vector<8x32xf32>
    %67 = arith.mulf %62, %64 : vector<8x32xf32>
    %68 = arith.addf %66, %67 : vector<8x32xf32>
    %69 = math.tanh %68 : vector<8x32xf32>
    %70 = arith.mulf %65, %69 : vector<8x32xf32>
    %c16 = arith.constant 16 : index
    %c0_24 = arith.constant 0 : index
    %71 = vector.load %arg14[%c16, %c0_24] : memref<64x32xf32, #tpu.memory_space<vmem>>, vector<8x32xf32>
    tpu.vector_store %arg14[%c16, %c0_24], %70 {strides = array<i32>} : memref<64x32xf32, #tpu.memory_space<vmem>>, vector<8x32xf32>,
    %72 = vector.extract_strided_slice %5 {offsets = [24, 0], sizes = [8, 128], strides = [1, 1]} : vector<64x128xf32> to vector<8x128xf32>
    %cst_25 = arith.constant dense<0.000000e+00> : vector<8x128xf32>
    %73 = tpu.matmul %70, %6, %cst_25 {dimension_numbers = #tpu.dot_dimension_numbers<[1], [0], [0], [1], [0, 0, 1, 1], [], []>} : vector<8x32xf32>, vector<32x128xf32>, vector<8x128xf32> -> vector<8x128xf32>
    %74 = arith.addf %72, %73 : vector<8x128xf32>
    %cst_26 = arith.constant 5.000000e-01 : f32
    %75 = vector.broadcast %cst_26 : f32 to vector<8x128xf32>
    %76 = arith.mulf %75, %74 : vector<8x128xf32>
    %77 = math.tanh %76 : vector<8x128xf32>
    %cst_27 = arith.constant 1.000000e+00 : f32
    %78 = vector.broadcast %cst_27 : f32 to vector<8x128xf32>
    %79 = arith.addf %77, %78 : vector<8x128xf32>
    %cst_28 = arith.constant 5.000000e-01 : f32
    %80 = vector.broadcast %cst_28 : f32 to vector<8x128xf32>
    %81 = arith.mulf %80, %79 : vector<8x128xf32>
    %82 = math.tanh %74 : vector<8x128xf32>
    %83 = vector.extract_strided_slice %81 {offsets = [0, 0], sizes = [8, 32], strides = [1, 1]} : vector<8x128xf32> to vector<8x32xf32>
    %84 = vector.extract_strided_slice %81 {offsets = [0, 32], sizes = [8, 32], strides = [1, 1]} : vector<8x128xf32> to vector<8x32xf32>
    %85 = vector.extract_strided_slice %82 {offsets = [0, 64], sizes = [8, 32], strides = [1, 1]} : vector<8x128xf32> to vector<8x32xf32>
    %86 = vector.extract_strided_slice %81 {offsets = [0, 96], sizes = [8, 32], strides = [1, 1]} : vector<8x128xf32> to vector<8x32xf32>
    %87 = arith.mulf %84, %68 : vector<8x32xf32>
    %88 = arith.mulf %83, %85 : vector<8x32xf32>
    %89 = arith.addf %87, %88 : vector<8x32xf32>
    %90 = math.tanh %89 : vector<8x32xf32>
    %91 = arith.mulf %86, %90 : vector<8x32xf32>
    %c24 = arith.constant 24 : index
    %c0_29 = arith.constant 0 : index
    %92 = vector.load %arg14[%c24, %c0_29] : memref<64x32xf32, #tpu.memory_space<vmem>>, vector<8x32xf32>
    tpu.vector_store %arg14[%c24, %c0_29], %91 {strides = array<i32>} : memref<64x32xf32, #tpu.memory_space<vmem>>, vector<8x32xf32>,
    %93 = vector.extract_strided_slice %5 {offsets = [32, 0], sizes = [8, 128], strides = [1, 1]} : vector<64x128xf32> to vector<8x128xf32>
    %cst_30 = arith.constant dense<0.000000e+00> : vector<8x128xf32>
    %94 = tpu.matmul %91, %6, %cst_30 {dimension_numbers = #tpu.dot_dimension_numbers<[1], [0], [0], [1], [0, 0, 1, 1], [], []>} : vector<8x32xf32>, vector<32x128xf32>, vector<8x128xf32> -> vector<8x128xf32>
    %95 = arith.addf %93, %94 : vector<8x128xf32>
    %cst_31 = arith.constant 5.000000e-01 : f32
    %96 = vector.broadcast %cst_31 : f32 to vector<8x128xf32>
    %97 = arith.mulf %96, %95 : vector<8x128xf32>
    %98 = math.tanh %97 : vector<8x128xf32>
    %cst_32 = arith.constant 1.000000e+00 : f32
    %99 = vector.broadcast %cst_32 : f32 to vector<8x128xf32>
    %100 = arith.addf %98, %99 : vector<8x128xf32>
    %cst_33 = arith.constant 5.000000e-01 : f32
    %101 = vector.broadcast %cst_33 : f32 to vector<8x128xf32>
    %102 = arith.mulf %101, %100 : vector<8x128xf32>
    %103 = math.tanh %95 : vector<8x128xf32>
    %104 = vector.extract_strided_slice %102 {offsets = [0, 0], sizes = [8, 32], strides = [1, 1]} : vector<8x128xf32> to vector<8x32xf32>
    %105 = vector.extract_strided_slice %102 {offsets = [0, 32], sizes = [8, 32], strides = [1, 1]} : vector<8x128xf32> to vector<8x32xf32>
    %106 = vector.extract_strided_slice %103 {offsets = [0, 64], sizes = [8, 32], strides = [1, 1]} : vector<8x128xf32> to vector<8x32xf32>
    %107 = vector.extract_strided_slice %102 {offsets = [0, 96], sizes = [8, 32], strides = [1, 1]} : vector<8x128xf32> to vector<8x32xf32>
    %108 = arith.mulf %105, %89 : vector<8x32xf32>
    %109 = arith.mulf %104, %106 : vector<8x32xf32>
    %110 = arith.addf %108, %109 : vector<8x32xf32>
    %111 = math.tanh %110 : vector<8x32xf32>
    %112 = arith.mulf %107, %111 : vector<8x32xf32>
    %c32 = arith.constant 32 : index
    %c0_34 = arith.constant 0 : index
    %113 = vector.load %arg14[%c32, %c0_34] : memref<64x32xf32, #tpu.memory_space<vmem>>, vector<8x32xf32>
    tpu.vector_store %arg14[%c32, %c0_34], %112 {strides = array<i32>} : memref<64x32xf32, #tpu.memory_space<vmem>>, vector<8x32xf32>,
    %114 = vector.extract_strided_slice %5 {offsets = [40, 0], sizes = [8, 128], strides = [1, 1]} : vector<64x128xf32> to vector<8x128xf32>
    %cst_35 = arith.constant dense<0.000000e+00> : vector<8x128xf32>
    %115 = tpu.matmul %112, %6, %cst_35 {dimension_numbers = #tpu.dot_dimension_numbers<[1], [0], [0], [1], [0, 0, 1, 1], [], []>} : vector<8x32xf32>, vector<32x128xf32>, vector<8x128xf32> -> vector<8x128xf32>
    %116 = arith.addf %114, %115 : vector<8x128xf32>
    %cst_36 = arith.constant 5.000000e-01 : f32
    %117 = vector.broadcast %cst_36 : f32 to vector<8x128xf32>
    %118 = arith.mulf %117, %116 : vector<8x128xf32>
    %119 = math.tanh %118 : vector<8x128xf32>
    %cst_37 = arith.constant 1.000000e+00 : f32
    %120 = vector.broadcast %cst_37 : f32 to vector<8x128xf32>
    %121 = arith.addf %119, %120 : vector<8x128xf32>
    %cst_38 = arith.constant 5.000000e-01 : f32
    %122 = vector.broadcast %cst_38 : f32 to vector<8x128xf32>
    %123 = arith.mulf %122, %121 : vector<8x128xf32>
    %124 = math.tanh %116 : vector<8x128xf32>
    %125 = vector.extract_strided_slice %123 {offsets = [0, 0], sizes = [8, 32], strides = [1, 1]} : vector<8x128xf32> to vector<8x32xf32>
    %126 = vector.extract_strided_slice %123 {offsets = [0, 32], sizes = [8, 32], strides = [1, 1]} : vector<8x128xf32> to vector<8x32xf32>
    %127 = vector.extract_strided_slice %124 {offsets = [0, 64], sizes = [8, 32], strides = [1, 1]} : vector<8x128xf32> to vector<8x32xf32>
    %128 = vector.extract_strided_slice %123 {offsets = [0, 96], sizes = [8, 32], strides = [1, 1]} : vector<8x128xf32> to vector<8x32xf32>
    %129 = arith.mulf %126, %110 : vector<8x32xf32>
    %130 = arith.mulf %125, %127 : vector<8x32xf32>
    %131 = arith.addf %129, %130 : vector<8x32xf32>
    %132 = math.tanh %131 : vector<8x32xf32>
    %133 = arith.mulf %128, %132 : vector<8x32xf32>
    %c40 = arith.constant 40 : index
    %c0_39 = arith.constant 0 : index
    %134 = vector.load %arg14[%c40, %c0_39] : memref<64x32xf32, #tpu.memory_space<vmem>>, vector<8x32xf32>
    tpu.vector_store %arg14[%c40, %c0_39], %133 {strides = array<i32>} : memref<64x32xf32, #tpu.memory_space<vmem>>, vector<8x32xf32>,
    %135 = vector.extract_strided_slice %5 {offsets = [48, 0], sizes = [8, 128], strides = [1, 1]} : vector<64x128xf32> to vector<8x128xf32>
    %cst_40 = arith.constant dense<0.000000e+00> : vector<8x128xf32>
    %136 = tpu.matmul %133, %6, %cst_40 {dimension_numbers = #tpu.dot_dimension_numbers<[1], [0], [0], [1], [0, 0, 1, 1], [], []>} : vector<8x32xf32>, vector<32x128xf32>, vector<8x128xf32> -> vector<8x128xf32>
    %137 = arith.addf %135, %136 : vector<8x128xf32>
    %cst_41 = arith.constant 5.000000e-01 : f32
    %138 = vector.broadcast %cst_41 : f32 to vector<8x128xf32>
    %139 = arith.mulf %138, %137 : vector<8x128xf32>
    %140 = math.tanh %139 : vector<8x128xf32>
    %cst_42 = arith.constant 1.000000e+00 : f32
    %141 = vector.broadcast %cst_42 : f32 to vector<8x128xf32>
    %142 = arith.addf %140, %141 : vector<8x128xf32>
    %cst_43 = arith.constant 5.000000e-01 : f32
    %143 = vector.broadcast %cst_43 : f32 to vector<8x128xf32>
    %144 = arith.mulf %143, %142 : vector<8x128xf32>
    %145 = math.tanh %137 : vector<8x128xf32>
    %146 = vector.extract_strided_slice %144 {offsets = [0, 0], sizes = [8, 32], strides = [1, 1]} : vector<8x128xf32> to vector<8x32xf32>
    %147 = vector.extract_strided_slice %144 {offsets = [0, 32], sizes = [8, 32], strides = [1, 1]} : vector<8x128xf32> to vector<8x32xf32>
    %148 = vector.extract_strided_slice %145 {offsets = [0, 64], sizes = [8, 32], strides = [1, 1]} : vector<8x128xf32> to vector<8x32xf32>
    %149 = vector.extract_strided_slice %144 {offsets = [0, 96], sizes = [8, 32], strides = [1, 1]} : vector<8x128xf32> to vector<8x32xf32>
    %150 = arith.mulf %147, %131 : vector<8x32xf32>
    %151 = arith.mulf %146, %148 : vector<8x32xf32>
    %152 = arith.addf %150, %151 : vector<8x32xf32>
    %153 = math.tanh %152 : vector<8x32xf32>
    %154 = arith.mulf %149, %153 : vector<8x32xf32>
    %c48 = arith.constant 48 : index
    %c0_44 = arith.constant 0 : index
    %155 = vector.load %arg14[%c48, %c0_44] : memref<64x32xf32, #tpu.memory_space<vmem>>, vector<8x32xf32>
    tpu.vector_store %arg14[%c48, %c0_44], %154 {strides = array<i32>} : memref<64x32xf32, #tpu.memory_space<vmem>>, vector<8x32xf32>,
    %156 = vector.extract_strided_slice %5 {offsets = [56, 0], sizes = [8, 128], strides = [1, 1]} : vector<64x128xf32> to vector<8x128xf32>
    %cst_45 = arith.constant dense<0.000000e+00> : vector<8x128xf32>
    %157 = tpu.matmul %154, %6, %cst_45 {dimension_numbers = #tpu.dot_dimension_numbers<[1], [0], [0], [1], [0, 0, 1, 1], [], []>} : vector<8x32xf32>, vector<32x128xf32>, vector<8x128xf32> -> vector<8x128xf32>
    %158 = arith.addf %156, %157 : vector<8x128xf32>
    %cst_46 = arith.constant 5.000000e-01 : f32
    %159 = vector.broadcast %cst_46 : f32 to vector<8x128xf32>
    %160 = arith.mulf %159, %158 : vector<8x128xf32>
    %161 = math.tanh %160 : vector<8x128xf32>
    %cst_47 = arith.constant 1.000000e+00 : f32
    %162 = vector.broadcast %cst_47 : f32 to vector<8x128xf32>
    %163 = arith.addf %161, %162 : vector<8x128xf32>
    %cst_48 = arith.constant 5.000000e-01 : f32
    %164 = vector.broadcast %cst_48 : f32 to vector<8x128xf32>
    %165 = arith.mulf %164, %163 : vector<8x128xf32>
    %166 = math.tanh %158 : vector<8x128xf32>
    %167 = vector.extract_strided_slice %165 {offsets = [0, 0], sizes = [8, 32], strides = [1, 1]} : vector<8x128xf32> to vector<8x32xf32>
    %168 = vector.extract_strided_slice %165 {offsets = [0, 32], sizes = [8, 32], strides = [1, 1]} : vector<8x128xf32> to vector<8x32xf32>
    %169 = vector.extract_strided_slice %166 {offsets = [0, 64], sizes = [8, 32], strides = [1, 1]} : vector<8x128xf32> to vector<8x32xf32>
    %170 = vector.extract_strided_slice %165 {offsets = [0, 96], sizes = [8, 32], strides = [1, 1]} : vector<8x128xf32> to vector<8x32xf32>
    %171 = arith.mulf %168, %152 : vector<8x32xf32>
    %172 = arith.mulf %167, %169 : vector<8x32xf32>
    %173 = arith.addf %171, %172 : vector<8x32xf32>
    %174 = math.tanh %173 : vector<8x32xf32>
    %175 = arith.mulf %170, %174 : vector<8x32xf32>
    %c56 = arith.constant 56 : index
    %c0_49 = arith.constant 0 : index
    %176 = vector.load %arg14[%c56, %c0_49] : memref<64x32xf32, #tpu.memory_space<vmem>>, vector<8x32xf32>
    tpu.vector_store %arg14[%c56, %c0_49], %175 {strides = array<i32>} : memref<64x32xf32, #tpu.memory_space<vmem>>, vector<8x32xf32>,
    %c0_50 = arith.constant 0 : index
    %c0_51 = arith.constant 0 : index
    %177 = vector.load %arg14[%c0_50, %c0_51] : memref<64x32xf32, #tpu.memory_space<vmem>>, vector<56x32xf32>
    %c0_52 = arith.constant 0 : index
    %c0_53 = arith.constant 0 : index
    %178 = vector.load %arg9[%c0_52, %c0_53] : memref<32x32xf32, #tpu.memory_space<vmem>>, vector<32x32xf32>
    %cst_54 = arith.constant dense<0.000000e+00> : vector<56x32xf32>
    %179 = tpu.matmul %177, %178, %cst_54 {dimension_numbers = #tpu.dot_dimension_numbers<[1], [0], [0], [1], [0, 0, 1, 1], [], []>} : vector<56x32xf32>, vector<32x32xf32>, vector<56x32xf32> -> vector<56x32xf32>
    %c0_55 = arith.constant 0 : index
    %c0_56 = arith.constant 0 : index
    %180 = vector.load %arg10[%c0_55, %c0_56] : memref<1x32xf32, #tpu.memory_space<vmem>>, vector<1x32xf32>
    %181 = vector.broadcast %180 : vector<1x32xf32> to vector<56x32xf32>
    %182 = arith.addf %179, %181 : vector<56x32xf32>
    %cst_57 = arith.constant 0.000000e+00 : f32
    %183 = vector.broadcast %cst_57 : f32 to vector<56x32xf32>
    %184 = arith.maximumf %182, %183 : vector<56x32xf32>
    %c0_58 = arith.constant 0 : index
    %c0_59 = arith.constant 0 : index
    %185 = vector.load %arg11[%c0_58, %c0_59] : memref<32x4xf32, #tpu.memory_space<vmem>>, vector<32x4xf32>
    %cst_60 = arith.constant dense<0.000000e+00> : vector<56x4xf32>
    %186 = tpu.matmul %184, %185, %cst_60 {dimension_numbers = #tpu.dot_dimension_numbers<[1], [0], [0], [1], [0, 0, 1, 1], [], []>} : vector<56x32xf32>, vector<32x4xf32>, vector<56x4xf32> -> vector<56x4xf32>
    %c0_61 = arith.constant 0 : index
    %c0_62 = arith.constant 0 : index
    %187 = vector.load %arg12[%c0_61, %c0_62] : memref<1x4xf32, #tpu.memory_space<vmem>>, vector<1x4xf32>
    %188 = vector.broadcast %187 : vector<1x4xf32> to vector<56x4xf32>
    %189 = arith.addf %186, %188 : vector<56x4xf32>
    %c0_63 = arith.constant 0 : index
    %c0_64 = arith.constant 0 : index
    %190 = vector.load %arg4[%c0_63, %c0_64] : memref<32x128xf32, #tpu.memory_space<vmem>>, vector<32x128xf32>
    %cst_65 = arith.constant dense<0.000000e+00> : vector<8x128xf32>
    %191 = tpu.matmul %175, %190, %cst_65 {dimension_numbers = #tpu.dot_dimension_numbers<[1], [0], [0], [1], [0, 0, 1, 1], [], []>} : vector<8x32xf32>, vector<32x128xf32>, vector<8x128xf32> -> vector<8x128xf32>
    %c0_66 = arith.constant 0 : index
    %c0_67 = arith.constant 0 : index
    %192 = vector.load %arg6[%c0_66, %c0_67] : memref<1x128xf32, #tpu.memory_space<vmem>>, vector<1x128xf32>
    %193 = vector.broadcast %192 : vector<1x128xf32> to vector<8x128xf32>
    %194 = arith.addf %191, %193 : vector<8x128xf32>
    %c0_68 = arith.constant 0 : index
    %c0_69 = arith.constant 0 : index
    %195 = vector.load %arg5[%c0_68, %c0_69] : memref<32x128xf32, #tpu.memory_space<vmem>>, vector<32x128xf32>
    %cst_70 = arith.constant 0.000000e+00 : f32
    %196 = vector.broadcast %cst_70 : f32 to vector<8x32xf32>
    %cst_71 = arith.constant 0.000000e+00 : f32
    %197 = vector.broadcast %cst_71 : f32 to vector<8x32xf32>
    %cst_72 = arith.constant dense<0.000000e+00> : vector<8x128xf32>
    %198 = tpu.matmul %196, %195, %cst_72 {dimension_numbers = #tpu.dot_dimension_numbers<[1], [0], [0], [1], [0, 0, 1, 1], [], []>} : vector<8x32xf32>, vector<32x128xf32>, vector<8x128xf32> -> vector<8x128xf32>
    %199 = arith.addf %194, %198 : vector<8x128xf32>
    %cst_73 = arith.constant 5.000000e-01 : f32
    %200 = vector.broadcast %cst_73 : f32 to vector<8x128xf32>
    %201 = arith.mulf %200, %199 : vector<8x128xf32>
    %202 = math.tanh %201 : vector<8x128xf32>
    %cst_74 = arith.constant 1.000000e+00 : f32
    %203 = vector.broadcast %cst_74 : f32 to vector<8x128xf32>
    %204 = arith.addf %202, %203 : vector<8x128xf32>
    %cst_75 = arith.constant 5.000000e-01 : f32
    %205 = vector.broadcast %cst_75 : f32 to vector<8x128xf32>
    %206 = arith.mulf %205, %204 : vector<8x128xf32>
    %207 = math.tanh %199 : vector<8x128xf32>
    %208 = vector.extract_strided_slice %206 {offsets = [0, 0], sizes = [8, 32], strides = [1, 1]} : vector<8x128xf32> to vector<8x32xf32>
    %209 = vector.extract_strided_slice %206 {offsets = [0, 32], sizes = [8, 32], strides = [1, 1]} : vector<8x128xf32> to vector<8x32xf32>
    %210 = vector.extract_strided_slice %207 {offsets = [0, 64], sizes = [8, 32], strides = [1, 1]} : vector<8x128xf32> to vector<8x32xf32>
    %211 = vector.extract_strided_slice %206 {offsets = [0, 96], sizes = [8, 32], strides = [1, 1]} : vector<8x128xf32> to vector<8x32xf32>
    %212 = arith.mulf %209, %197 : vector<8x32xf32>
    %213 = arith.mulf %208, %210 : vector<8x32xf32>
    %214 = arith.addf %212, %213 : vector<8x32xf32>
    %215 = math.tanh %214 : vector<8x32xf32>
    %216 = arith.mulf %211, %215 : vector<8x32xf32>
    %c0_76 = arith.constant 0 : index
    %c0_77 = arith.constant 0 : index
    %217 = vector.load %arg15[%c0_76, %c0_77] : memref<64x32xf32, #tpu.memory_space<vmem>>, vector<8x32xf32>
    tpu.vector_store %arg15[%c0_76, %c0_77], %216 {strides = array<i32>} : memref<64x32xf32, #tpu.memory_space<vmem>>, vector<8x32xf32>,
    %cst_78 = arith.constant dense<0.000000e+00> : vector<8x128xf32>
    %218 = tpu.matmul %216, %195, %cst_78 {dimension_numbers = #tpu.dot_dimension_numbers<[1], [0], [0], [1], [0, 0, 1, 1], [], []>} : vector<8x32xf32>, vector<32x128xf32>, vector<8x128xf32> -> vector<8x128xf32>
    %219 = arith.addf %194, %218 : vector<8x128xf32>
    %cst_79 = arith.constant 5.000000e-01 : f32
    %220 = vector.broadcast %cst_79 : f32 to vector<8x128xf32>
    %221 = arith.mulf %220, %219 : vector<8x128xf32>
    %222 = math.tanh %221 : vector<8x128xf32>
    %cst_80 = arith.constant 1.000000e+00 : f32
    %223 = vector.broadcast %cst_80 : f32 to vector<8x128xf32>
    %224 = arith.addf %222, %223 : vector<8x128xf32>
    %cst_81 = arith.constant 5.000000e-01 : f32
    %225 = vector.broadcast %cst_81 : f32 to vector<8x128xf32>
    %226 = arith.mulf %225, %224 : vector<8x128xf32>
    %227 = math.tanh %219 : vector<8x128xf32>
    %228 = vector.extract_strided_slice %226 {offsets = [0, 0], sizes = [8, 32], strides = [1, 1]} : vector<8x128xf32> to vector<8x32xf32>
    %229 = vector.extract_strided_slice %226 {offsets = [0, 32], sizes = [8, 32], strides = [1, 1]} : vector<8x128xf32> to vector<8x32xf32>
    %230 = vector.extract_strided_slice %227 {offsets = [0, 64], sizes = [8, 32], strides = [1, 1]} : vector<8x128xf32> to vector<8x32xf32>
    %231 = vector.extract_strided_slice %226 {offsets = [0, 96], sizes = [8, 32], strides = [1, 1]} : vector<8x128xf32> to vector<8x32xf32>
    %232 = arith.mulf %229, %214 : vector<8x32xf32>
    %233 = arith.mulf %228, %230 : vector<8x32xf32>
    %234 = arith.addf %232, %233 : vector<8x32xf32>
    %235 = math.tanh %234 : vector<8x32xf32>
    %236 = arith.mulf %231, %235 : vector<8x32xf32>
    %c8_82 = arith.constant 8 : index
    %c0_83 = arith.constant 0 : index
    %237 = vector.load %arg15[%c8_82, %c0_83] : memref<64x32xf32, #tpu.memory_space<vmem>>, vector<8x32xf32>
    tpu.vector_store %arg15[%c8_82, %c0_83], %236 {strides = array<i32>} : memref<64x32xf32, #tpu.memory_space<vmem>>, vector<8x32xf32>,
    %cst_84 = arith.constant dense<0.000000e+00> : vector<8x128xf32>
    %238 = tpu.matmul %236, %195, %cst_84 {dimension_numbers = #tpu.dot_dimension_numbers<[1], [0], [0], [1], [0, 0, 1, 1], [], []>} : vector<8x32xf32>, vector<32x128xf32>, vector<8x128xf32> -> vector<8x128xf32>
    %239 = arith.addf %194, %238 : vector<8x128xf32>
    %cst_85 = arith.constant 5.000000e-01 : f32
    %240 = vector.broadcast %cst_85 : f32 to vector<8x128xf32>
    %241 = arith.mulf %240, %239 : vector<8x128xf32>
    %242 = math.tanh %241 : vector<8x128xf32>
    %cst_86 = arith.constant 1.000000e+00 : f32
    %243 = vector.broadcast %cst_86 : f32 to vector<8x128xf32>
    %244 = arith.addf %242, %243 : vector<8x128xf32>
    %cst_87 = arith.constant 5.000000e-01 : f32
    %245 = vector.broadcast %cst_87 : f32 to vector<8x128xf32>
    %246 = arith.mulf %245, %244 : vector<8x128xf32>
    %247 = math.tanh %239 : vector<8x128xf32>
    %248 = vector.extract_strided_slice %246 {offsets = [0, 0], sizes = [8, 32], strides = [1, 1]} : vector<8x128xf32> to vector<8x32xf32>
    %249 = vector.extract_strided_slice %246 {offsets = [0, 32], sizes = [8, 32], strides = [1, 1]} : vector<8x128xf32> to vector<8x32xf32>
    %250 = vector.extract_strided_slice %247 {offsets = [0, 64], sizes = [8, 32], strides = [1, 1]} : vector<8x128xf32> to vector<8x32xf32>
    %251 = vector.extract_strided_slice %246 {offsets = [0, 96], sizes = [8, 32], strides = [1, 1]} : vector<8x128xf32> to vector<8x32xf32>
    %252 = arith.mulf %249, %234 : vector<8x32xf32>
    %253 = arith.mulf %248, %250 : vector<8x32xf32>
    %254 = arith.addf %252, %253 : vector<8x32xf32>
    %255 = math.tanh %254 : vector<8x32xf32>
    %256 = arith.mulf %251, %255 : vector<8x32xf32>
    %c16_88 = arith.constant 16 : index
    %c0_89 = arith.constant 0 : index
    %257 = vector.load %arg15[%c16_88, %c0_89] : memref<64x32xf32, #tpu.memory_space<vmem>>, vector<8x32xf32>
    tpu.vector_store %arg15[%c16_88, %c0_89], %256 {strides = array<i32>} : memref<64x32xf32, #tpu.memory_space<vmem>>, vector<8x32xf32>,
    %cst_90 = arith.constant dense<0.000000e+00> : vector<8x128xf32>
    %258 = tpu.matmul %256, %195, %cst_90 {dimension_numbers = #tpu.dot_dimension_numbers<[1], [0], [0], [1], [0, 0, 1, 1], [], []>} : vector<8x32xf32>, vector<32x128xf32>, vector<8x128xf32> -> vector<8x128xf32>
    %259 = arith.addf %194, %258 : vector<8x128xf32>
    %cst_91 = arith.constant 5.000000e-01 : f32
    %260 = vector.broadcast %cst_91 : f32 to vector<8x128xf32>
    %261 = arith.mulf %260, %259 : vector<8x128xf32>
    %262 = math.tanh %261 : vector<8x128xf32>
    %cst_92 = arith.constant 1.000000e+00 : f32
    %263 = vector.broadcast %cst_92 : f32 to vector<8x128xf32>
    %264 = arith.addf %262, %263 : vector<8x128xf32>
    %cst_93 = arith.constant 5.000000e-01 : f32
    %265 = vector.broadcast %cst_93 : f32 to vector<8x128xf32>
    %266 = arith.mulf %265, %264 : vector<8x128xf32>
    %267 = math.tanh %259 : vector<8x128xf32>
    %268 = vector.extract_strided_slice %266 {offsets = [0, 0], sizes = [8, 32], strides = [1, 1]} : vector<8x128xf32> to vector<8x32xf32>
    %269 = vector.extract_strided_slice %266 {offsets = [0, 32], sizes = [8, 32], strides = [1, 1]} : vector<8x128xf32> to vector<8x32xf32>
    %270 = vector.extract_strided_slice %267 {offsets = [0, 64], sizes = [8, 32], strides = [1, 1]} : vector<8x128xf32> to vector<8x32xf32>
    %271 = vector.extract_strided_slice %266 {offsets = [0, 96], sizes = [8, 32], strides = [1, 1]} : vector<8x128xf32> to vector<8x32xf32>
    %272 = arith.mulf %269, %254 : vector<8x32xf32>
    %273 = arith.mulf %268, %270 : vector<8x32xf32>
    %274 = arith.addf %272, %273 : vector<8x32xf32>
    %275 = math.tanh %274 : vector<8x32xf32>
    %276 = arith.mulf %271, %275 : vector<8x32xf32>
    %c24_94 = arith.constant 24 : index
    %c0_95 = arith.constant 0 : index
    %277 = vector.load %arg15[%c24_94, %c0_95] : memref<64x32xf32, #tpu.memory_space<vmem>>, vector<8x32xf32>
    tpu.vector_store %arg15[%c24_94, %c0_95], %276 {strides = array<i32>} : memref<64x32xf32, #tpu.memory_space<vmem>>, vector<8x32xf32>,
    %cst_96 = arith.constant dense<0.000000e+00> : vector<8x128xf32>
    %278 = tpu.matmul %276, %195, %cst_96 {dimension_numbers = #tpu.dot_dimension_numbers<[1], [0], [0], [1], [0, 0, 1, 1], [], []>} : vector<8x32xf32>, vector<32x128xf32>, vector<8x128xf32> -> vector<8x128xf32>
    %279 = arith.addf %194, %278 : vector<8x128xf32>
    %cst_97 = arith.constant 5.000000e-01 : f32
    %280 = vector.broadcast %cst_97 : f32 to vector<8x128xf32>
    %281 = arith.mulf %280, %279 : vector<8x128xf32>
    %282 = math.tanh %281 : vector<8x128xf32>
    %cst_98 = arith.constant 1.000000e+00 : f32
    %283 = vector.broadcast %cst_98 : f32 to vector<8x128xf32>
    %284 = arith.addf %282, %283 : vector<8x128xf32>
    %cst_99 = arith.constant 5.000000e-01 : f32
    %285 = vector.broadcast %cst_99 : f32 to vector<8x128xf32>
    %286 = arith.mulf %285, %284 : vector<8x128xf32>
    %287 = math.tanh %279 : vector<8x128xf32>
    %288 = vector.extract_strided_slice %286 {offsets = [0, 0], sizes = [8, 32], strides = [1, 1]} : vector<8x128xf32> to vector<8x32xf32>
    %289 = vector.extract_strided_slice %286 {offsets = [0, 32], sizes = [8, 32], strides = [1, 1]} : vector<8x128xf32> to vector<8x32xf32>
    %290 = vector.extract_strided_slice %287 {offsets = [0, 64], sizes = [8, 32], strides = [1, 1]} : vector<8x128xf32> to vector<8x32xf32>
    %291 = vector.extract_strided_slice %286 {offsets = [0, 96], sizes = [8, 32], strides = [1, 1]} : vector<8x128xf32> to vector<8x32xf32>
    %292 = arith.mulf %289, %274 : vector<8x32xf32>
    %293 = arith.mulf %288, %290 : vector<8x32xf32>
    %294 = arith.addf %292, %293 : vector<8x32xf32>
    %295 = math.tanh %294 : vector<8x32xf32>
    %296 = arith.mulf %291, %295 : vector<8x32xf32>
    %c32_100 = arith.constant 32 : index
    %c0_101 = arith.constant 0 : index
    %297 = vector.load %arg15[%c32_100, %c0_101] : memref<64x32xf32, #tpu.memory_space<vmem>>, vector<8x32xf32>
    tpu.vector_store %arg15[%c32_100, %c0_101], %296 {strides = array<i32>} : memref<64x32xf32, #tpu.memory_space<vmem>>, vector<8x32xf32>,
    %cst_102 = arith.constant dense<0.000000e+00> : vector<8x128xf32>
    %298 = tpu.matmul %296, %195, %cst_102 {dimension_numbers = #tpu.dot_dimension_numbers<[1], [0], [0], [1], [0, 0, 1, 1], [], []>} : vector<8x32xf32>, vector<32x128xf32>, vector<8x128xf32> -> vector<8x128xf32>
    %299 = arith.addf %194, %298 : vector<8x128xf32>
    %cst_103 = arith.constant 5.000000e-01 : f32
    %300 = vector.broadcast %cst_103 : f32 to vector<8x128xf32>
    %301 = arith.mulf %300, %299 : vector<8x128xf32>
    %302 = math.tanh %301 : vector<8x128xf32>
    %cst_104 = arith.constant 1.000000e+00 : f32
    %303 = vector.broadcast %cst_104 : f32 to vector<8x128xf32>
    %304 = arith.addf %302, %303 : vector<8x128xf32>
    %cst_105 = arith.constant 5.000000e-01 : f32
    %305 = vector.broadcast %cst_105 : f32 to vector<8x128xf32>
    %306 = arith.mulf %305, %304 : vector<8x128xf32>
    %307 = math.tanh %299 : vector<8x128xf32>
    %308 = vector.extract_strided_slice %306 {offsets = [0, 0], sizes = [8, 32], strides = [1, 1]} : vector<8x128xf32> to vector<8x32xf32>
    %309 = vector.extract_strided_slice %306 {offsets = [0, 32], sizes = [8, 32], strides = [1, 1]} : vector<8x128xf32> to vector<8x32xf32>
    %310 = vector.extract_strided_slice %307 {offsets = [0, 64], sizes = [8, 32], strides = [1, 1]} : vector<8x128xf32> to vector<8x32xf32>
    %311 = vector.extract_strided_slice %306 {offsets = [0, 96], sizes = [8, 32], strides = [1, 1]} : vector<8x128xf32> to vector<8x32xf32>
    %312 = arith.mulf %309, %294 : vector<8x32xf32>
    %313 = arith.mulf %308, %310 : vector<8x32xf32>
    %314 = arith.addf %312, %313 : vector<8x32xf32>
    %315 = math.tanh %314 : vector<8x32xf32>
    %316 = arith.mulf %311, %315 : vector<8x32xf32>
    %c40_106 = arith.constant 40 : index
    %c0_107 = arith.constant 0 : index
    %317 = vector.load %arg15[%c40_106, %c0_107] : memref<64x32xf32, #tpu.memory_space<vmem>>, vector<8x32xf32>
    tpu.vector_store %arg15[%c40_106, %c0_107], %316 {strides = array<i32>} : memref<64x32xf32, #tpu.memory_space<vmem>>, vector<8x32xf32>,
    %cst_108 = arith.constant dense<0.000000e+00> : vector<8x128xf32>
    %318 = tpu.matmul %316, %195, %cst_108 {dimension_numbers = #tpu.dot_dimension_numbers<[1], [0], [0], [1], [0, 0, 1, 1], [], []>} : vector<8x32xf32>, vector<32x128xf32>, vector<8x128xf32> -> vector<8x128xf32>
    %319 = arith.addf %194, %318 : vector<8x128xf32>
    %cst_109 = arith.constant 5.000000e-01 : f32
    %320 = vector.broadcast %cst_109 : f32 to vector<8x128xf32>
    %321 = arith.mulf %320, %319 : vector<8x128xf32>
    %322 = math.tanh %321 : vector<8x128xf32>
    %cst_110 = arith.constant 1.000000e+00 : f32
    %323 = vector.broadcast %cst_110 : f32 to vector<8x128xf32>
    %324 = arith.addf %322, %323 : vector<8x128xf32>
    %cst_111 = arith.constant 5.000000e-01 : f32
    %325 = vector.broadcast %cst_111 : f32 to vector<8x128xf32>
    %326 = arith.mulf %325, %324 : vector<8x128xf32>
    %327 = math.tanh %319 : vector<8x128xf32>
    %328 = vector.extract_strided_slice %326 {offsets = [0, 0], sizes = [8, 32], strides = [1, 1]} : vector<8x128xf32> to vector<8x32xf32>
    %329 = vector.extract_strided_slice %326 {offsets = [0, 32], sizes = [8, 32], strides = [1, 1]} : vector<8x128xf32> to vector<8x32xf32>
    %330 = vector.extract_strided_slice %327 {offsets = [0, 64], sizes = [8, 32], strides = [1, 1]} : vector<8x128xf32> to vector<8x32xf32>
    %331 = vector.extract_strided_slice %326 {offsets = [0, 96], sizes = [8, 32], strides = [1, 1]} : vector<8x128xf32> to vector<8x32xf32>
    %332 = arith.mulf %329, %314 : vector<8x32xf32>
    %333 = arith.mulf %328, %330 : vector<8x32xf32>
    %334 = arith.addf %332, %333 : vector<8x32xf32>
    %335 = math.tanh %334 : vector<8x32xf32>
    %336 = arith.mulf %331, %335 : vector<8x32xf32>
    %c48_112 = arith.constant 48 : index
    %c0_113 = arith.constant 0 : index
    %337 = vector.load %arg15[%c48_112, %c0_113] : memref<64x32xf32, #tpu.memory_space<vmem>>, vector<8x32xf32>
    tpu.vector_store %arg15[%c48_112, %c0_113], %336 {strides = array<i32>} : memref<64x32xf32, #tpu.memory_space<vmem>>, vector<8x32xf32>,
    %cst_114 = arith.constant dense<0.000000e+00> : vector<8x128xf32>
    %338 = tpu.matmul %336, %195, %cst_114 {dimension_numbers = #tpu.dot_dimension_numbers<[1], [0], [0], [1], [0, 0, 1, 1], [], []>} : vector<8x32xf32>, vector<32x128xf32>, vector<8x128xf32> -> vector<8x128xf32>
    %339 = arith.addf %194, %338 : vector<8x128xf32>
    %cst_115 = arith.constant 5.000000e-01 : f32
    %340 = vector.broadcast %cst_115 : f32 to vector<8x128xf32>
    %341 = arith.mulf %340, %339 : vector<8x128xf32>
    %342 = math.tanh %341 : vector<8x128xf32>
    %cst_116 = arith.constant 1.000000e+00 : f32
    %343 = vector.broadcast %cst_116 : f32 to vector<8x128xf32>
    %344 = arith.addf %342, %343 : vector<8x128xf32>
    %cst_117 = arith.constant 5.000000e-01 : f32
    %345 = vector.broadcast %cst_117 : f32 to vector<8x128xf32>
    %346 = arith.mulf %345, %344 : vector<8x128xf32>
    %347 = math.tanh %339 : vector<8x128xf32>
    %348 = vector.extract_strided_slice %346 {offsets = [0, 0], sizes = [8, 32], strides = [1, 1]} : vector<8x128xf32> to vector<8x32xf32>
    %349 = vector.extract_strided_slice %346 {offsets = [0, 32], sizes = [8, 32], strides = [1, 1]} : vector<8x128xf32> to vector<8x32xf32>
    %350 = vector.extract_strided_slice %347 {offsets = [0, 64], sizes = [8, 32], strides = [1, 1]} : vector<8x128xf32> to vector<8x32xf32>
    %351 = vector.extract_strided_slice %346 {offsets = [0, 96], sizes = [8, 32], strides = [1, 1]} : vector<8x128xf32> to vector<8x32xf32>
    %352 = arith.mulf %349, %334 : vector<8x32xf32>
    %353 = arith.mulf %348, %350 : vector<8x32xf32>
    %354 = arith.addf %352, %353 : vector<8x32xf32>
    %355 = math.tanh %354 : vector<8x32xf32>
    %356 = arith.mulf %351, %355 : vector<8x32xf32>
    %c56_118 = arith.constant 56 : index
    %c0_119 = arith.constant 0 : index
    %357 = vector.load %arg15[%c56_118, %c0_119] : memref<64x32xf32, #tpu.memory_space<vmem>>, vector<8x32xf32>
    tpu.vector_store %arg15[%c56_118, %c0_119], %356 {strides = array<i32>} : memref<64x32xf32, #tpu.memory_space<vmem>>, vector<8x32xf32>,
    %c0_120 = arith.constant 0 : index
    %c0_121 = arith.constant 0 : index
    %358 = vector.load %arg15[%c0_120, %c0_121] : memref<64x32xf32, #tpu.memory_space<vmem>>, vector<64x32xf32>
    %c0_122 = arith.constant 0 : index
    %c0_123 = arith.constant 0 : index
    %359 = vector.load %arg7[%c0_122, %c0_123] : memref<32x4xf32, #tpu.memory_space<vmem>>, vector<32x4xf32>
    %cst_124 = arith.constant dense<0.000000e+00> : vector<64x4xf32>
    %360 = tpu.matmul %358, %359, %cst_124 {dimension_numbers = #tpu.dot_dimension_numbers<[1], [0], [0], [1], [0, 0, 1, 1], [], []>} : vector<64x32xf32>, vector<32x4xf32>, vector<64x4xf32> -> vector<64x4xf32>
    %c0_125 = arith.constant 0 : index
    %c0_126 = arith.constant 0 : index
    %361 = vector.load %arg8[%c0_125, %c0_126] : memref<1x4xf32, #tpu.memory_space<vmem>>, vector<1x4xf32>
    %362 = vector.broadcast %361 : vector<1x4xf32> to vector<64x4xf32>
    %363 = arith.addf %360, %362 : vector<64x4xf32>
    %c0_127 = arith.constant 0 : index
    %c0_128 = arith.constant 0 : index
    %364 = vector.load %arg13[%c0_127, %c0_128] : memref<64x8xf32, #tpu.memory_space<vmem>>, vector<64x4xf32>
    tpu.vector_store %arg13[%c0_127, %c0_128], %363 {strides = array<i32>} : memref<64x8xf32, #tpu.memory_space<vmem>>, vector<64x4xf32>,
    %c0_129 = arith.constant 0 : index
    %c4 = arith.constant 4 : index
    %365 = vector.load %arg13[%c0_129, %c4] : memref<64x8xf32, #tpu.memory_space<vmem>>, vector<56x4xf32>
    tpu.vector_store %arg13[%c0_129, %c4], %189 {strides = array<i32>} : memref<64x8xf32, #tpu.memory_space<vmem>>, vector<56x4xf32>,
    %cst_130 = arith.constant 0.000000e+00 : f32
    %366 = vector.broadcast %cst_130 : f32 to vector<8x4xf32>
    %c56_131 = arith.constant 56 : index
    %c4_132 = arith.constant 4 : index
    %367 = vector.load %arg13[%c56_131, %c4_132] : memref<64x8xf32, #tpu.memory_space<vmem>>, vector<8x4xf32>
    tpu.vector_store %arg13[%c56_131, %c4_132], %366 {strides = array<i32>} : memref<64x8xf32, #tpu.memory_space<vmem>>, vector<8x4xf32>,
    return
  }
}

</mosaic_0001>

<bundles_post_ra>
// kernel: lstm_autoencoder_forward.1
= control target key start
LH: loop header
LB: loop body
LE: loop exit
PB: predicated region body
PF: predicated region fallthrough
CT: control target
= control target key end

     0   :  { %vm85_vm0 = vcmask 1043456   ;;  %vm60_vm1 = vcmask 31744   ;;  %v3042_v3 = vmov 0.0|0.0   ;;  %vm3043_vm2 = vmmov 0   ;;  %s3046_s16 = smov 32   ;;  %s3047_s26 = smov 4   ;;  %s3634_s1 = inlined_call_operand.vmem [shape: f32[4,128], index: 1, kind: input, shape index: {}]   ;;  %s3635_s0 = inlined_call_operand.vmem [shape: f32[64,4], index: 0, kind: input, shape index: {}]   ;;  %s3636_s2 = inlined_call_operand.vmem [shape: f32[32,128], index: 2, kind: input, shape index: {}]   ;;  %s3637_s3 = inlined_call_operand.vmem [shape: f32[1,128], index: 3, kind: input, shape index: {}]   ;;  %s3638_s9 = inlined_call_operand.vmem [shape: f32[32,32], index: 9, kind: input, shape index: {}]   ;;  %s3639_s11 = inlined_call_operand.vmem [shape: f32[32,4], index: 11, kind: input, shape index: {}]   ;;  %s3640_s10 = inlined_call_operand.vmem [shape: f32[1,32], index: 10, kind: input, shape index: {}]   ;;  %s3641_s4 = inlined_call_operand.vmem [shape: f32[32,128], index: 4, kind: input, shape index: {}]   ;;  %s3642_s5 = inlined_call_operand.vmem [shape: f32[32,128], index: 5, kind: input, shape index: {}]   ;;  %s3643_s6 = inlined_call_operand.vmem [shape: f32[1,128], index: 6, kind: input, shape index: {}]   ;;  %s3644_s7 = inlined_call_operand.vmem [shape: f32[32,4], index: 7, kind: input, shape index: {}]   ;;  %s3645_s8 = inlined_call_operand.vmem [shape: f32[1,4], index: 8, kind: input, shape index: {}]   ;;  %s3646_s13 = inlined_call_operand.vmem [shape: f32[64,8], index: 13, kind: output, shape index: {}]   ;;  %s3647_s12 = inlined_call_operand.vmem [shape: f32[1,4], index: 12, kind: input, shape index: {}]  }
   0x1   :  { %v52_v0 = vld [vmem:[%s3634_s1] sm:$0xf]  ;;  %v45_v2 = vld [vmem:[%s3635_s0 + $0x8] sm:$0xff]  ;;  %2824 = vmatprep.subr.bf16.mxu1 %v3042_v3  ;;  %v46_v6 = vld [vmem:[%s3635_s0 + $0x10] sm:$0xff]  ;;  %v3044_v8 = vmov 0.0   ;;  %vm198_vm3 = vcmask 261120  }
   0x2   :  { %v44_v1 = vld [vmem:[%s3635_s0] sm:$0xff]  ;;  %2539 = vmatprep.subr.msk.mxu0 %vm85_vm0, %v52_v0  ;;  %v195_v5 = vld [vmem:[%s3636_s2 + $0x8] sm:$0xff]  ;;  %2572 = vmatprep.mubr.msk.f32.mxu1 %vm3043_vm2, %v3044_v8  ;;  %v196_v9 = vld [vmem:[%s3636_s2 + $0x10] sm:$0xff]  ;;  %vm2347_vm4 = vcmask 64544  }
   0x3   :  { %2541 = vmatprep.mubr.msk.f32.mxu0 %vm60_vm1, %v44_v1  ;;  %v194_v4 = vld [vmem:[%s3636_s2] sm:$0xff]  ;;  %2540 = vmatpush3.msk.msra.mxu0 %vm85_vm0, %v52_v0  ;;  %v197_v10 = vld [vmem:[%s3636_s2 + $0x18] sm:$0xff]  ;;  %v49_v14 = vld [vmem:[%s3635_s0 + $0x28] sm:$0xff] }
   0x4   :  { %v3138_v7 = vpack.c.bf16 %v195_v5, %v194_v4  ;;  %2542 = vmatmul.mubr.msk.f32.vlgmr.msra.gmra.mrb[0].mxu0 %vm60_vm1, %v45_v2  ;;  %2818 = vmatprep.subr.bf16.mxu0 %v3042_v3  ;;  %v47_v11 = vld [vmem:[%s3635_s0 + $0x18] sm:$0xff]  ;;  %v3155_v12 = vpack.c.bf16 %v197_v10, %v196_v9  ;;  %v48_v13 = vld [vmem:[%s3635_s0 + $0x20] sm:$0xff]  ;;  %v50_v15 = vld [vmem:[%s3635_s0 + $0x30] sm:$0xff] }
   0x5   :  { %2544 = vmatprep.mubr.msk.f32.mxu0 %vm60_vm1, %v46_v6  ;;  %v51_v16 = vld [vmem:[%s3635_s0 + $0x38] sm:$0xff]  ;;  %v2360_v17 = vld [vmem:[%s3637_s3] ss:$0 sm:$0xff]  ;;  %s3045_s3 = smov 64  }
   0x6   :  { %2820 = vmatpush3.bf16.msra.mxu0 %v3138_v7  ;;  %2826 = vmatpush3.bf16.msra.mxu1 %v3138_v7 }
   0x7   :  { %2821 = vmatprep.subr.bf16.mxu0 %v3042_v3  ;;  %2827 = vmatprep.subr.bf16.mxu1 %v3042_v3 }
   0x8   :  { %2545 = vmatmul.mubr.msk.f32.gmra.mrb[2].mxu0 %vm60_vm1, %v47_v11 }
   0x9   :  { %2547 = vmatprep.mubr.msk.f32.mxu0 %vm60_vm1, %v48_v13 }
   0xa   :  { %2823 = vmatpush3.bf16.msra.mxu0 %v3155_v12  ;;  %2829 = vmatpush3.bf16.msra.mxu1 %v3155_v12 }
   0xb   :  { %2830 = vmatprep.subr.bf16.mxu0 %v3042_v3  ;;  %2836 = vmatprep.subr.bf16.mxu1 %v3042_v3 }
   0xc   :  { %2548 = vmatmul.mubr.msk.f32.gmra.mrb[4].mxu0 %vm60_vm1, %v49_v14 }
   0xd   :  { %2550 = vmatprep.mubr.msk.f32.mxu0 %vm60_vm1, %v50_v15 }
  0x10   :  { %2551 = vmatmul.mubr.msk.f32.gmra.mrb[6].mxu0 %vm60_vm1, %v51_v16 }
  0x11   :  { %2561 = vmatprep.mubr.msk.f32.mxu0 %vm3043_vm2, %v3044_v8 }
  0x14   :  { %2562 = vmatmul.mubr.f32.vlgmr.msra.gmra.mrb[8].mxu0 %v3044_v8 }
  0x15   :  { %2832 = vmatpush3.bf16.msra.mxu0 %v3138_v7  ;;  %2583 = vmatprep.mubr.msk.f32.mxu0 %vm3043_vm2, %v3044_v8 }
  0x16   :  { %2833 = vmatprep.subr.bf16.mxu0 %v3042_v3 }
  0x19   :  { %2835 = vmatpush3.bf16.msra.mxu0 %v3155_v12 }
  0x1a   :  { %2842 = vmatprep.subr.bf16.mxu0 %v3042_v3 }
  0xd7   :  { %v2543_v18 = vpop.f32.mrb[0].mxu0 }
  0xd8   :  { %v161_v19 = vadd.f32 %v2543_v18, %v2360_v17  ;;  %v155_v20 = vpop.f32.mrb[1].mxu0 }
  0xd9   :  { %v156_v33 = vadd.f32 %v2360_v17, %v155_v20 }
  0xdb   :  { %v2546_v21 = vpop.f32.mrb[2].mxu0 }
  0xdc   :  { %v3193_v22 = vadd.f32 %v2546_v21, %v2360_v17  ;;  %v165_v23 = vpop.f32.mrb[3].mxu0 }
  0xdd   :  { %v3195_v24 = vadd.f32 %v2360_v17, %v165_v23 }
  0xdf   :  { %v2549_v25 = vpop.f32.mrb[4].mxu0 }
  0xe0   :  { %v3197_v26 = vadd.f32 %v2549_v25, %v2360_v17  ;;  %v175_v27 = vpop.f32.mrb[5].mxu0 }
  0xe1   :  { %v3199_v28 = vadd.f32 %v2360_v17, %v175_v27 }
  0xe3   :  { %v2552_v29 = vpop.f32.mrb[6].mxu0 }
  0xe4   :  { %v3201_v30 = vadd.f32 %v2552_v29, %v2360_v17  ;;  %v185_v31 = vpop.f32.mrb[7].mxu0 }
  0xe5   :  { %v3203_v32 = vadd.f32 %v2360_v17, %v185_v31 }
  0xe7   :  { %v268_v34 = vpop.f32.mrb[8].mxu0 }
  0xe8   :  { %v272_v35 = vadd.f32 %v268_v34, %v156_v33  ;;  %v2563_v36 = vpop.f32.mrb[9].mxu0 }
  0xea   :  { %2946 = vtanh.f32 %v272_v35  ;;  %v273_v38 = vmul.f32 0.5, %v272_v35 }
  0xec   :  { %2948 = vtanh.f32 %v273_v38 }
  0xf4   :  { %v2947_v37 = vpop.eup %2946 }
  0xf5   :  { %280 = vrot.lane.b32.xlu0 %v2947_v37, %s3045_s3 }
  0xf6   :  { %v2949_v39 = vpop.eup %2948 }
  0xf7   :  { %v275_v40 = vadd.f32 1.0, %v2949_v39 }
  0xf9   :  { %v276_v41 = vmul.f32 0.5, %v275_v40 }
  0xfb   :  { %v278_v44 = vmul.f32 0.0, %v276_v41 }
 0x167   :  { %v281_v42 = vpop.permute.xlu0 %280 }
 0x168   :  { %v283_v43 = vmul.f32 %v281_v42, %v276_v41 }
 0x16a   :  { %285 = vrot.lane.b32.xlu0 %v283_v43, %s3046_s16 }
 0x1dc   :  { %v286_v45 = vpop.permute.xlu0 %285 }
 0x1dd   :  { %v288_v46 = vadd.f32 %v286_v45, %v278_v44 }
 0x1df   :  { %2950 = vtanh.f32 %v288_v46 }
 0x1e9   :  { %v2951_v47 = vpop.eup %2950 }
 0x1ea   :  { %291 = vrot.lane.b32.xlu1 %v2951_v47, %s3045_s3 }
 0x25c   :  { %v292_v48 = vpop.permute.xlu1 %291 }
 0x25d   :  { %v294_v49 = vmul.f32 %v292_v48, %v276_v41 }
 0x25f   :  { %296 = vrot.lane.b32.xlu1 %v294_v49, %s3046_s16 }
 0x2d1   :  { %v297_v50 = vpop.permute.xlu1 %296 }
 0x2d2   :  { %299 = vst.msk [vmem:[#allocation2] sm:$0xff] %vm198_vm3, %v297_v50  ;;  %2573 = vmatmul.mubr.msk.f32.vlgmr.msra.gmra.mrb[0].mxu1 %vm198_vm3, %v297_v50 }
 0x2d3   :  { %2838 = vmatpush3.bf16.msra.mxu1 %v3138_v7  ;;  %2594 = vmatprep.mubr.msk.f32.mxu1 %vm3043_vm2, %v3044_v8 }
 0x2d4   :  { %2839 = vmatprep.subr.bf16.mxu1 %v3042_v3 }
 0x2d7   :  { %2841 = vmatpush3.bf16.msra.mxu1 %v3155_v12 }
 0x2d8   :  { %2848 = vmatprep.subr.bf16.mxu1 %v3042_v3 }
 0x3a5   :  { %v368_v51 = vpop.f32.mrb[0].mxu1 }
 0x3a6   :  { %v372_v52 = vadd.f32 %v368_v51, %v161_v19  ;;  %v2574_v53 = vpop.f32.mrb[1].mxu1 }
 0x3a8   :  { %2952 = vtanh.f32 %v372_v52  ;;  %v373_v55 = vmul.f32 0.5, %v372_v52 }
 0x3aa   :  { %2954 = vtanh.f32 %v373_v55 }
 0x3b2   :  { %v2953_v54 = vpop.eup %2952 }
 0x3b3   :  { %380 = vrot.lane.b32.xlu0 %v2953_v54, %s3045_s3 }
 0x3b4   :  { %v2955_v56 = vpop.eup %2954 }
 0x3b5   :  { %v375_v57 = vadd.f32 1.0, %v2955_v56 }
 0x3b7   :  { %v376_v58 = vmul.f32 0.5, %v375_v57 }
 0x3b9   :  { %v378_v61 = vmul.f32 %v376_v58, %v288_v46 }
 0x425   :  { %v381_v59 = vpop.permute.xlu0 %380 }
 0x426   :  { %v383_v60 = vmul.f32 %v381_v59, %v376_v58 }
 0x428   :  { %385 = vrot.lane.b32.xlu1 %v383_v60, %s3046_s16 }
 0x49a   :  { %v386_v62 = vpop.permute.xlu1 %385 }
 0x49b   :  { %v388_v63 = vadd.f32 %v386_v62, %v378_v61 }
 0x49d   :  { %2956 = vtanh.f32 %v388_v63 }
 0x4a7   :  { %v2957_v0 = vpop.eup %2956 }
 0x4a8   :  { %391 = vrot.lane.b32.xlu0 %v2957_v0, %s3045_s3 }
 0x51a   :  { %v392_v1 = vpop.permute.xlu0 %391 }
 0x51b   :  { %v394_v2 = vmul.f32 %v392_v1, %v376_v58 }
 0x51d   :  { %396 = vrot.lane.b32.xlu1 %v394_v2, %s3046_s16 }
 0x58f   :  { %v397_v4 = vpop.permute.xlu1 %396 }
 0x590   :  { %399 = vst.msk [vmem:[#allocation2 + $0x8] sm:$0xff] %vm198_vm3, %v397_v4  ;;  %2584 = vmatmul.mubr.msk.f32.vlgmr.msra.gmra.mrb[10].mxu0 %vm198_vm3, %v397_v4 }
 0x591   :  { %2844 = vmatpush3.bf16.msra.mxu0 %v3138_v7  ;;  %2605 = vmatprep.mubr.msk.f32.mxu0 %vm3043_vm2, %v3044_v8 }
 0x592   :  { %2845 = vmatprep.subr.bf16.mxu0 %v3042_v3 }
 0x595   :  { %2847 = vmatpush3.bf16.msra.mxu0 %v3155_v12 }
 0x596   :  { %2854 = vmatprep.subr.bf16.mxu0 %v3042_v3 }
 0x663   :  { %v468_v5 = vpop.f32.mrb[10].mxu0 }
 0x664   :  { %v472_v6 = vadd.f32 %v468_v5, %v3195_v24  ;;  %v2585_v9 = vpop.f32.mrb[11].mxu0 }
 0x666   :  { %2958 = vtanh.f32 %v472_v6  ;;  %v473_v11 = vmul.f32 0.5, %v472_v6 }
 0x668   :  { %2960 = vtanh.f32 %v473_v11 }
 0x670   :  { %v2959_v10 = vpop.eup %2958 }
 0x671   :  { %480 = vrot.lane.b32.xlu0 %v2959_v10, %s3045_s3 }
 0x672   :  { %v2961_v13 = vpop.eup %2960 }
 0x673   :  { %v475_v14 = vadd.f32 1.0, %v2961_v13 }
 0x675   :  { %v476_v15 = vmul.f32 0.5, %v475_v14 }
 0x677   :  { %v478_v18 = vmul.f32 %v476_v15, %v388_v63 }
 0x6e3   :  { %v481_v16 = vpop.permute.xlu0 %480 }
 0x6e4   :  { %v483_v17 = vmul.f32 %v481_v16, %v476_v15  ;;  %v1008_v16 = vld [vmem:[%s3638_s9 + $0x8] sm:$0xff] }
 0x6e6   :  { %485 = vrot.lane.b32.xlu1 %v483_v17, %s3046_s16 }
 0x758   :  { %v486_v19 = vpop.permute.xlu1 %485 }
 0x759   :  { %v488_v20 = vadd.f32 %v486_v19, %v478_v18  ;;  %v1009_v18 = vld [vmem:[%s3638_s9 + $0x10] sm:$0xff]  ;;  %v1010_v19 = vld [vmem:[%s3638_s9 + $0x18] sm:$0xff] }
 0x75b   :  { %2962 = vtanh.f32 %v488_v20 }
 0x765   :  { %v2963_v21 = vpop.eup %2962 }
 0x766   :  { %491 = vrot.lane.b32.xlu0 %v2963_v21, %s3045_s3  ;;  %v2870_v21 = vpack.c.bf16 %v1010_v19, %v1009_v18 }
 0x7d8   :  { %v492_v23 = vpop.permute.xlu0 %491 }
 0x7d9   :  { %v494_v24 = vmul.f32 %v492_v23, %v476_v15  ;;  %v1007_v15 = vld [vmem:[%s3638_s9] sm:$0xff] }
 0x7da   :  { %v2867_v17 = vpack.c.bf16 %v1008_v16, %v1007_v15  ;;  %v1000_v23 = vld [vmem:[#allocation2] sm:$0xff] }
 0x7db   :  { %496 = vrot.lane.b32.xlu1 %v494_v24, %s3046_s16  ;;  %v1001_v24 = vld [vmem:[#allocation2 + $0x8] sm:$0xff] }
 0x84d   :  { %v497_v25 = vpop.permute.xlu1 %496 }
 0x84e   :  { %499 = vst.msk [vmem:[#allocation2 + $0x10] sm:$0xff] %vm198_vm3, %v497_v25  ;;  %2595 = vmatmul.mubr.msk.f32.vlgmr.msra.gmra.mrb[2].mxu1 %vm198_vm3, %v497_v25 }
 0x84f   :  { %2850 = vmatpush3.bf16.msra.mxu1 %v3138_v7  ;;  %2616 = vmatprep.mubr.msk.f32.mxu1 %vm3043_vm2, %v3044_v8 }
 0x850   :  { %2851 = vmatprep.subr.bf16.mxu1 %v3042_v3 }
 0x853   :  { %2853 = vmatpush3.bf16.msra.mxu1 %v3155_v12 }
 0x854   :  { %2860 = vmatprep.subr.bf16.mxu1 %v3042_v3 }
 0x855   :  { %v1002_v25 = vld [vmem:[#allocation2 + $0x10] sm:$0xff] }
 0x921   :  { %v568_v27 = vpop.f32.mrb[2].mxu1 }
 0x922   :  { %v572_v29 = vadd.f32 %v568_v27, %v3193_v22  ;;  %v2596_v31 = vpop.f32.mrb[3].mxu1 }
 0x924   :  { %2964 = vtanh.f32 %v572_v29  ;;  %v573_v34 = vmul.f32 0.5, %v572_v29 }
 0x926   :  { %2966 = vtanh.f32 %v573_v34 }
 0x92e   :  { %v2965_v33 = vpop.eup %2964 }
 0x92f   :  { %580 = vrot.lane.b32.xlu0 %v2965_v33, %s3045_s3 }
 0x930   :  { %v2967_v35 = vpop.eup %2966 }
 0x931   :  { %v575_v36 = vadd.f32 1.0, %v2967_v35 }
 0x933   :  { %v576_v37 = vmul.f32 0.5, %v575_v36 }
 0x935   :  { %v578_v40 = vmul.f32 %v576_v37, %v488_v20 }
 0x9a1   :  { %v581_v38 = vpop.permute.xlu0 %580 }
 0x9a2   :  { %v583_v39 = vmul.f32 %v581_v38, %v576_v37 }
 0x9a4   :  { %585 = vrot.lane.b32.xlu1 %v583_v39, %s3046_s16 }
 0xa16   :  { %v586_v41 = vpop.permute.xlu1 %585 }
 0xa17   :  { %v588_v42 = vadd.f32 %v586_v41, %v578_v40 }
 0xa19   :  { %2968 = vtanh.f32 %v588_v42 }
 0xa23   :  { %v2969_v43 = vpop.eup %2968 }
 0xa24   :  { %591 = vrot.lane.b32.xlu0 %v2969_v43, %s3045_s3 }
 0xa96   :  { %v592_v22 = vpop.permute.xlu0 %591 }
 0xa97   :  { %v594_v44 = vmul.f32 %v592_v22, %v576_v37 }
 0xa99   :  { %596 = vrot.lane.b32.xlu1 %v594_v44, %s3046_s16 }
 0xb0b   :  { %v597_v45 = vpop.permute.xlu1 %596 }
 0xb0c   :  { %599 = vst.msk [vmem:[#allocation2 + $0x18] sm:$0xff] %vm198_vm3, %v597_v45  ;;  %2606 = vmatmul.mubr.msk.f32.vlgmr.msra.gmra.mrb[12].mxu0 %vm198_vm3, %v597_v45 }
 0xb0d   :  { %2856 = vmatpush3.bf16.msra.mxu0 %v3138_v7  ;;  %2627 = vmatprep.mubr.msk.f32.mxu0 %vm3043_vm2, %v3044_v8 }
 0xb0e   :  { %2857 = vmatprep.subr.bf16.mxu0 %v3042_v3 }
 0xb11   :  { %2859 = vmatpush3.bf16.msra.mxu0 %v3155_v12 }
 0xb12   :  { %2866 = vmatprep.subr.bf16.mxu0 %v3042_v3 }
 0xb13   :  { %v1003_v27 = vld [vmem:[#allocation2 + $0x18] sm:$0xff] }
 0xbdf   :  { %v668_v46 = vpop.f32.mrb[12].mxu0 }
 0xbe0   :  { %v672_v47 = vadd.f32 %v668_v46, %v3199_v28  ;;  %v2607_v48 = vpop.f32.mrb[13].mxu0 }
 0xbe2   :  { %2970 = vtanh.f32 %v672_v47  ;;  %v673_v50 = vmul.f32 0.5, %v672_v47 }
 0xbe4   :  { %2972 = vtanh.f32 %v673_v50 }
 0xbec   :  { %v2971_v49 = vpop.eup %2970 }
 0xbed   :  { %680 = vrot.lane.b32.xlu0 %v2971_v49, %s3045_s3 }
 0xbee   :  { %v2973_v51 = vpop.eup %2972 }
 0xbef   :  { %v675_v52 = vadd.f32 1.0, %v2973_v51 }
 0xbf1   :  { %v676_v53 = vmul.f32 0.5, %v675_v52 }
 0xbf3   :  { %v678_v56 = vmul.f32 %v676_v53, %v588_v42 }
 0xc5f   :  { %v681_v54 = vpop.permute.xlu0 %680 }
 0xc60   :  { %v683_v55 = vmul.f32 %v681_v54, %v676_v53 }
 0xc62   :  { %685 = vrot.lane.b32.xlu1 %v683_v55, %s3046_s16 }
 0xcd4   :  { %v686_v57 = vpop.permute.xlu1 %685 }
 0xcd5   :  { %v688_v58 = vadd.f32 %v686_v57, %v678_v56 }
 0xcd7   :  { %2974 = vtanh.f32 %v688_v58 }
 0xce1   :  { %v2975_v59 = vpop.eup %2974 }
 0xce2   :  { %691 = vrot.lane.b32.xlu0 %v2975_v59, %s3045_s3  ;;  %v1146_v59 = vld [vmem:[%s3639_s11] sm:$0xff] }
 0xd54   :  { %v692_v28 = vpop.permute.xlu0 %691 }
 0xd55   :  { %v694_v60 = vmul.f32 %v692_v28, %v676_v53  ;;  %v1147_v28 = vld [vmem:[%s3639_s11 + $0x8] sm:$0xff] }
 0xd57   :  { %696 = vrot.lane.b32.xlu1 %v694_v60, %s3046_s16  ;;  %v2873_v60 = vpack.c.bf16 %v1147_v28, %v1146_v59 }
 0xdc9   :  { %v697_v61 = vpop.permute.xlu1 %696 }
 0xdca   :  { %699 = vst.msk [vmem:[#allocation2 + $0x20] sm:$0xff] %vm198_vm3, %v697_v61  ;;  %2617 = vmatmul.mubr.msk.f32.vlgmr.msra.gmra.mrb[4].mxu1 %vm198_vm3, %v697_v61  ;;  %v1148_v61 = vld [vmem:[%s3639_s11 + $0x10] sm:$0xff] }
 0xdcb   :  { %2862 = vmatpush3.bf16.msra.mxu1 %v3138_v7  ;;  %2638 = vmatprep.mubr.msk.f32.mxu1 %vm3043_vm2, %v3044_v8 }
 0xdcc   :  { %2863 = vmatprep.subr.bf16.mxu1 %v3042_v3 }
 0xdcf   :  { %2865 = vmatpush3.bf16.msra.mxu1 %v3155_v12 }
 0xdd0   :  { %2872 = vmatprep.subr.bf16.mxu1 %v3042_v3 }
 0xdd1   :  { %v1004_v29 = vld [vmem:[#allocation2 + $0x20] sm:$0xff] }
 0xe9d   :  { %v768_v62 = vpop.f32.mrb[4].mxu1 }
 0xe9e   :  { %v772_v63 = vadd.f32 %v768_v62, %v3197_v26  ;;  %v2618_v0 = vpop.f32.mrb[5].mxu1  ;;  %v1149_v62 = vld [vmem:[%s3639_s11 + $0x18] sm:$0xff] }
 0xea0   :  { %2976 = vtanh.f32 %v772_v63  ;;  %v773_v2 = vmul.f32 0.5, %v772_v63  ;;  %v2377_v63 = vld [vmem:[%s3640_s10] ss:$0 sm:$0xff] }
 0xea2   :  { %2978 = vtanh.f32 %v773_v2 }
 0xeaa   :  { %v2977_v1 = vpop.eup %2976 }
 0xeab   :  { %780 = vrot.lane.b32.xlu0 %v2977_v1, %s3045_s3  ;;  %v2876_v1 = vpack.c.bf16 %v1149_v62, %v1148_v61 }
 0xeac   :  { %v2979_v7 = vpop.eup %2978 }
 0xead   :  { %v775_v4 = vadd.f32 1.0, %v2979_v7 }
 0xeaf   :  { %v776_v5 = vmul.f32 0.5, %v775_v4 }
 0xeb1   :  { %v778_v12 = vmul.f32 %v776_v5, %v688_v58 }
 0xf1d   :  { %v781_v6 = vpop.permute.xlu0 %780 }
 0xf1e   :  { %v783_v9 = vmul.f32 %v781_v6, %v776_v5 }
 0xf20   :  { %785 = vrot.lane.b32.xlu1 %v783_v9, %s3046_s16 }
 0xf92   :  { %v786_v10 = vpop.permute.xlu1 %785 }
 0xf93   :  { %v3271_v11 = vadd.f32 %v786_v10, %v778_v12 }
 0xf95   :  { %2980 = vtanh.f32 %v3271_v11 }
 0xf9f   :  { %v2981_v26 = vpop.eup %2980 }
 0xfa0   :  { %791 = vrot.lane.b32.xlu0 %v2981_v26, %s3045_s3 }
0x1012   :  { %v792_v13 = vpop.permute.xlu0 %791 }
0x1013   :  { %v794_v14 = vmul.f32 %v792_v13, %v776_v5 }
0x1015   :  { %796 = vrot.lane.b32.xlu1 %v794_v14, %s3046_s16 }
0x1087   :  { %v797_v20 = vpop.permute.xlu1 %796 }
0x1088   :  { %799 = vst.msk [vmem:[#allocation2 + $0x28] sm:$0xff] %vm198_vm3, %v797_v20  ;;  %2628 = vmatmul.mubr.msk.f32.vlgmr.msra.gmra.mrb[14].mxu0 %vm198_vm3, %v797_v20 }
0x1089   :  { %2868 = vmatpush3.bf16.msra.mxu0 %v2867_v17  ;;  %2649 = vmatprep.mubr.msk.f32.mxu0 %vm3043_vm2, %v3044_v8 }
0x108a   :  { %2869 = vmatprep.subr.bf16.mxu0 %v3042_v3 }
0x108d   :  { %2871 = vmatpush3.bf16.msra.mxu0 %v2870_v21 }
0x108e   :  { %2878 = vmatprep.subr.bf16.mxu0 %v3042_v3 }
0x108f   :  { %v1005_v31 = vld [vmem:[#allocation2 + $0x28] sm:$0xff] }
0x1090   :  { %2650 = vmatmul.mubr.msk.f32.vlgmr.msra.gmra.mrb[16].mxu0 %vm198_vm3, %v1000_v23 }
0x1091   :  { %2652 = vmatprep.mubr.msk.f32.mxu0 %vm3043_vm2, %v3044_v8 }
0x1094   :  { %2653 = vmatmul.mubr.msk.f32.gmra.mrb[18].mxu0 %vm198_vm3, %v1001_v24 }
0x1095   :  { %2655 = vmatprep.mubr.msk.f32.mxu0 %vm3043_vm2, %v3044_v8 }
0x1098   :  { %2656 = vmatmul.mubr.msk.f32.gmra.mrb[20].mxu0 %vm198_vm3, %v1002_v25 }
0x1099   :  { %2658 = vmatprep.mubr.msk.f32.mxu0 %vm3043_vm2, %v3044_v8 }
0x109c   :  { %2659 = vmatmul.mubr.msk.f32.gmra.mrb[22].mxu0 %vm198_vm3, %v1003_v27 }
0x109d   :  { %2661 = vmatprep.mubr.msk.f32.mxu0 %vm3043_vm2, %v3044_v8 }
0x10a0   :  { %2662 = vmatmul.mubr.msk.f32.gmra.mrb[24].mxu0 %vm198_vm3, %v1004_v29 }
0x10a1   :  { %2664 = vmatprep.mubr.msk.f32.mxu0 %vm3043_vm2, %v3044_v8 }
0x10a4   :  { %2665 = vmatmul.mubr.msk.f32.gmra.mrb[26].mxu0 %vm198_vm3, %v1005_v31 }
0x10a5   :  { %2667 = vmatprep.mubr.msk.f32.mxu0 %vm3043_vm2, %v3044_v8 }
0x115b   :  { %v868_v33 = vpop.f32.mrb[14].mxu0 }
0x115c   :  { %v872_v34 = vadd.f32 %v868_v33, %v3203_v32  ;;  %v2629_v35 = vpop.f32.mrb[15].mxu0 }
0x115e   :  { %2982 = vtanh.f32 %v872_v34  ;;  %v873_v48 = vmul.f32 0.5, %v872_v34 }
0x1160   :  { %2984 = vtanh.f32 %v873_v48 }
0x1163   :  { %v1105_v36 = vpop.f32.mrb[16].mxu0 }
0x1164   :  { %v2651_v37 = vpop.f32.mrb[17].mxu0  ;;  %v1106_v2 = vadd.f32 %v2377_v63, %v1105_v36 }
0x1166   :  { %v1139_v7 = vmax.f32 %v1106_v2, 0.0  ;;  %v2393_v2 = vld [vmem:[%s3643_s6] ss:$0 sm:$0xff] }
0x1167   :  { %v1110_v38 = vpop.f32.mrb[18].mxu0 }
0x1168   :  { %v2983_v39 = vpop.eup %2982  ;;  %v2654_v40 = vpop.f32.mrb[19].mxu0  ;;  %v1111_v4 = vadd.f32 %v2377_v63, %v1110_v38 }
0x1169   :  { %880 = vrot.lane.b32.xlu0 %v2983_v39, %s3045_s3 }
0x116a   :  { %v2985_v32 = vpop.eup %2984  ;;  %v1140_v6 = vmax.f32 %v1111_v4, 0.0 }
0x116b   :  { %v1115_v41 = vpop.f32.mrb[20].mxu0  ;;  %v875_v49 = vadd.f32 1.0, %v2985_v32 }
0x116c   :  { %v2657_v42 = vpop.f32.mrb[21].mxu0  ;;  %v1116_v9 = vadd.f32 %v2377_v63, %v1115_v41 }
0x116d   :  { %v876_v50 = vmul.f32 0.5, %v875_v49  ;;  %v1278_v49 = vld [vmem:[%s3641_s4] sm:$0xff] }
0x116e   :  { %v1141_v12 = vmax.f32 %v1116_v9, 0.0 }
0x116f   :  { %v1120_v43 = vpop.f32.mrb[22].mxu0  ;;  %v878_v53 = vmul.f32 %v876_v50, %v3271_v11 }
0x1170   :  { %v2660_v22 = vpop.f32.mrb[23].mxu0  ;;  %v1121_v10 = vadd.f32 %v2377_v63, %v1120_v43 }
0x1172   :  { %v1142_v11 = vmax.f32 %v1121_v10, 0.0 }
0x1173   :  { %v1125_v44 = vpop.f32.mrb[24].mxu0 }
0x1174   :  { %v2663_v45 = vpop.f32.mrb[25].mxu0  ;;  %v1126_v26 = vadd.f32 %v2377_v63, %v1125_v44 }
0x1176   :  { %v1143_v13 = vmax.f32 %v1126_v26, 0.0 }
0x1177   :  { %v1130_v46 = vpop.f32.mrb[26].mxu0 }
0x1178   :  { %v2666_v47 = vpop.f32.mrb[27].mxu0  ;;  %v1131_v14 = vadd.f32 %v2377_v63, %v1130_v46 }
0x117a   :  { %v1144_v15 = vmax.f32 %v1131_v14, 0.0 }
0x11db   :  { %v881_v51 = vpop.permute.xlu0 %880 }
0x11dc   :  { %v883_v52 = vmul.f32 %v881_v51, %v876_v50  ;;  %v1361_v51 = vld [vmem:[%s3642_s5] sm:$0xff] }
0x11de   :  { %885 = vrot.lane.b32.xlu1 %v883_v52, %s3046_s16 }
0x1250   :  { %v886_v54 = vpop.permute.xlu1 %885 }
0x1251   :  { %v3316_v55 = vadd.f32 %v886_v54, %v878_v53  ;;  %v1362_v53 = vld [vmem:[%s3642_s5 + $0x8] sm:$0xff]  ;;  %v1280_v54 = vld [vmem:[%s3641_s4 + $0x10] sm:$0xff] }
0x1253   :  { %2986 = vtanh.f32 %v3316_v55 }
0x125d   :  { %v2987_v56 = vpop.eup %2986 }
0x125e   :  { %891 = vrot.lane.b32.xlu0 %v2987_v56, %s3045_s3  ;;  %v3402_v56 = vpack.c.bf16 %v1362_v53, %v1361_v51 }
0x12d0   :  { %v892_v57 = vpop.permute.xlu0 %891 }
0x12d1   :  { %v894_v58 = vmul.f32 %v892_v57, %v876_v50  ;;  %v1279_v50 = vld [vmem:[%s3641_s4 + $0x8] sm:$0xff]  ;;  %v1363_v57 = vld [vmem:[%s3642_s5 + $0x10] sm:$0xff] }
0x12d2   :  { %v2879_v52 = vpack.c.bf16 %v1279_v50, %v1278_v49 }
0x12d3   :  { %896 = vrot.lane.b32.xlu1 %v894_v58, %s3046_s16  ;;  %v1364_v58 = vld [vmem:[%s3642_s5 + $0x18] sm:$0xff] }
0x12d4   :  { %2880 = vmatpush3.bf16.msra.mxu0 %v2879_v52  ;;  %v3412_v28 = vpack.c.bf16 %v1364_v58, %v1363_v57 }
0x12d5   :  { %2881 = vmatprep.subr.bf16.mxu0 %v3042_v3 }
0x1345   :  { %v897_v0 = vpop.permute.xlu1 %896 }
0x1346   :  { %899 = vst.msk [vmem:[#allocation2 + $0x30] sm:$0xff] %vm198_vm3, %v897_v0  ;;  %2639 = vmatmul.mubr.msk.f32.vlgmr.msra.gmra.mrb[6].mxu1 %vm198_vm3, %v897_v0 }
0x1347   :  { %2874 = vmatpush3.bf16.msra.mxu1 %v2873_v60  ;;  %2678 = vmatprep.mubr.msk.f32.mxu1 %vm3043_vm2, %v3044_v8 }
0x1348   :  { %2875 = vmatprep.subr.bf16.mxu1 %v3042_v3 }
0x134b   :  { %2877 = vmatpush3.bf16.msra.mxu1 %v2876_v1 }
0x134c   :  { %2884 = vmatprep.subr.bf16.mxu1 %v3042_v3 }
0x134d   :  { %v1006_v5 = vld [vmem:[#allocation2 + $0x30] sm:$0xff] }
0x134e   :  { %2679 = vmatmul.mubr.msk.f32.vlgmr.msra.gmra.mrb[8].mxu1 %vm198_vm3, %v1139_v7  ;;  %2668 = vmatmul.mubr.msk.f32.gmra.mrb[28].mxu0 %vm198_vm3, %v1006_v5 }
0x134f   :  { %2681 = vmatprep.mubr.msk.f32.mxu1 %vm3043_vm2, %v3044_v8  ;;  %2707 = vmatprep.mubr.msk.f32.mxu0 %vm3043_vm2, %v3044_v8 }
0x1350   :  { %2886 = vmatpush3.bf16.msra.mxu1 %v3402_v56 }
0x1351   :  { %2887 = vmatprep.subr.bf16.mxu1 %v3042_v3 }
0x1352   :  { %2682 = vmatmul.mubr.msk.f32.gmra.mrb[10].mxu1 %vm198_vm3, %v1140_v6 }
0x1353   :  { %2684 = vmatprep.mubr.msk.f32.mxu1 %vm3043_vm2, %v3044_v8 }
0x1354   :  { %2889 = vmatpush3.bf16.msra.mxu1 %v3412_v28 }
0x1355   :  { %2896 = vmatprep.subr.bf16.mxu1 %v3042_v3 }
0x1356   :  { %2685 = vmatmul.mubr.msk.f32.gmra.mrb[12].mxu1 %vm198_vm3, %v1141_v12 }
0x1357   :  { %2687 = vmatprep.mubr.msk.f32.mxu1 %vm3043_vm2, %v3044_v8 }
0x135a   :  { %2688 = vmatmul.mubr.msk.f32.gmra.mrb[14].mxu1 %vm198_vm3, %v1142_v11 }
0x135b   :  { %2690 = vmatprep.mubr.msk.f32.mxu1 %vm3043_vm2, %v3044_v8 }
0x135e   :  { %2691 = vmatmul.mubr.msk.f32.gmra.mrb[16].mxu1 %vm198_vm3, %v1143_v13 }
0x135f   :  { %2693 = vmatprep.mubr.msk.f32.mxu1 %vm3043_vm2, %v3044_v8 }
0x1362   :  { %2694 = vmatmul.mubr.msk.f32.gmra.mrb[18].mxu1 %vm198_vm3, %v1144_v15 }
0x1363   :  { %2696 = vmatprep.mubr.msk.f32.mxu1 %vm3043_vm2, %v3044_v8 }
0x1419   :  { %v968_v16 = vpop.f32.mrb[6].mxu1 }
0x141a   :  { %v972_v17 = vadd.f32 %v968_v16, %v3201_v30  ;;  %v2640_v18 = vpop.f32.mrb[7].mxu1 }
0x141c   :  { %2988 = vtanh.f32 %v972_v17  ;;  %v973_v40 = vmul.f32 0.5, %v972_v17 }
0x141e   :  { %2990 = vtanh.f32 %v973_v40 }
0x1421   :  { %v3364_v19 = vpop.f32.mrb[8].mxu1  ;;  %v1135_v20 = vpop.f32.mrb[28].mxu0 }
0x1422   :  { %v1136_v21 = vadd.f32 %v2377_v63, %v1135_v20  ;;  %v2680_v23 = vpop.f32.mrb[9].mxu1  ;;  %v2669_v24 = vpop.f32.mrb[29].mxu0 }
0x1424   :  { %v1145_v25 = vmax.f32 %v1136_v21, 0.0 }
0x1425   :  { %v3366_v27 = vpop.f32.mrb[10].mxu1 }
0x1426   :  { %v2989_v29 = vpop.eup %2988  ;;  %v2683_v31 = vpop.f32.mrb[11].mxu1  ;;  %2697 = vmatmul.mubr.msk.f32.gmra.mrb[20].mxu1 %vm198_vm3, %v1145_v25 }
0x1427   :  { %980 = vrot.lane.b32.xlu0 %v2989_v29, %s3045_s3  ;;  %2718 = vmatprep.mubr.msk.f32.mxu1 %vm3043_vm2, %v3044_v8 }
0x1428   :  { %v2991_v41 = vpop.eup %2990 }
0x1429   :  { %v3372_v30 = vpop.f32.mrb[12].mxu1  ;;  %v975_v42 = vadd.f32 1.0, %v2991_v41 }
0x142a   :  { %v2686_v33 = vpop.f32.mrb[13].mxu1  ;;  %2719 = vmatmul.mubr.f32.vlgmr.msra.gmra.mrb[22].mxu1 %v3044_v8 }
0x142b   :  { %v976_v43 = vmul.f32 0.5, %v975_v42  ;;  %2898 = vmatpush3.bf16.msra.mxu1 %v3402_v56  ;;  %2740 = vmatprep.mubr.msk.f32.mxu1 %vm3043_vm2, %v3044_v8 }
0x142c   :  { %2899 = vmatprep.subr.bf16.mxu1 %v3042_v3 }
0x142d   :  { %v3374_v34 = vpop.f32.mrb[14].mxu1  ;;  %v978_v47 = vmul.f32 %v976_v43, %v3316_v55  ;;  %v1281_v55 = vld [vmem:[%s3641_s4 + $0x18] sm:$0xff] }
0x142e   :  { %v2689_v35 = vpop.f32.mrb[15].mxu1  ;;  %v2882_v59 = vpack.c.bf16 %v1281_v55, %v1280_v54 }
0x142f   :  { %2901 = vmatpush3.bf16.msra.mxu1 %v3412_v28 }
0x1430   :  { %2883 = vmatpush3.bf16.msra.mxu0 %v2882_v59  ;;  %2908 = vmatprep.subr.bf16.mxu1 %v3042_v3 }
0x1431   :  { %v3376_v36 = vpop.f32.mrb[16].mxu1  ;;  %2890 = vmatprep.subr.bf16.mxu0 %v3042_v3 }
0x1432   :  { %v2692_v37 = vpop.f32.mrb[17].mxu1 }
0x1435   :  { %v3378_v38 = vpop.f32.mrb[18].mxu1 }
0x1436   :  { %v2695_v39 = vpop.f32.mrb[19].mxu1 }
0x1499   :  { %v981_v22 = vpop.permute.xlu0 %980 }
0x149a   :  { %v983_v44 = vmul.f32 %v981_v22, %v976_v43 }
0x149c   :  { %985 = vrot.lane.b32.xlu1 %v983_v44, %s3046_s16 }
0x14f9   :  { %v3381_v45 = vpop.f32.mrb[20].mxu1 }
0x14fa   :  { %v2698_v46 = vpop.f32.mrb[21].mxu1 }
0x14fd   :  { %v1431_v0 = vpop.f32.mrb[22].mxu1 }
0x14fe   :  { %v2720_v1 = vpop.f32.mrb[23].mxu1 }
0x150e   :  { %v986_v48 = vpop.permute.xlu1 %985 }
0x150f   :  { %v988_v32 = vadd.f32 %v986_v48, %v978_v47 }
0x1511   :  { %2992 = vtanh.f32 %v988_v32 }
0x151b   :  { %v2993_v60 = vpop.eup %2992 }
0x151c   :  { %991 = vrot.lane.b32.xlu0 %v2993_v60, %s3045_s3 }
0x158e   :  { %v992_v61 = vpop.permute.xlu0 %991 }
0x158f   :  { %v994_v62 = vmul.f32 %v992_v61, %v976_v43 }
0x1591   :  { %996 = vrot.lane.b32.xlu1 %v994_v62, %s3046_s16 }
0x1603   :  { %v997_v63 = vpop.permute.xlu1 %996 }
0x1604   :  { %2708 = vmatmul.mubr.msk.f32.vlgmr.msra.gmra.mrb[30].mxu0 %vm198_vm3, %v997_v63 }
0x1605   :  { %2892 = vmatpush3.bf16.msra.mxu0 %v3402_v56  ;;  %2729 = vmatprep.mubr.msk.f32.mxu0 %vm3043_vm2, %v3044_v8 }
0x1606   :  { %2893 = vmatprep.subr.bf16.mxu0 %v3042_v3 }
0x1609   :  { %2895 = vmatpush3.bf16.msra.mxu0 %v3412_v28 }
0x160a   :  { %2902 = vmatprep.subr.bf16.mxu0 %v3042_v3 }
0x16d7   :  { %v1357_v7 = vpop.f32.mrb[30].mxu0 }
0x16d8   :  { %v3437_v4 = vadd.f32 %v2393_v2, %v1357_v7  ;;  %v2709_v5 = vpop.f32.mrb[31].mxu0 }
0x16da   :  { %v1435_v6 = vadd.f32 %v1431_v0, %v3437_v4 }
0x16dc   :  { %2994 = vtanh.f32 %v1435_v6  ;;  %v1436_v12 = vmul.f32 0.5, %v1435_v6 }
0x16de   :  { %2996 = vtanh.f32 %v1436_v12 }
0x16e6   :  { %v2995_v9 = vpop.eup %2994 }
0x16e7   :  { %1443 = vrot.lane.b32.xlu0 %v2995_v9, %s3045_s3 }
0x16e8   :  { %v2997_v10 = vpop.eup %2996 }
0x16e9   :  { %v1438_v11 = vadd.f32 1.0, %v2997_v10 }
0x16eb   :  { %v1439_v26 = vmul.f32 0.5, %v1438_v11 }
0x16ed   :  { %v1441_v15 = vmul.f32 0.0, %v1439_v26 }
0x1759   :  { %v1444_v13 = vpop.permute.xlu0 %1443 }
0x175a   :  { %v1446_v14 = vmul.f32 %v1444_v13, %v1439_v26 }
0x175c   :  { %1448 = vrot.lane.b32.xlu1 %v1446_v14, %s3046_s16 }
0x17ce   :  { %v1449_v16 = vpop.permute.xlu1 %1448 }
0x17cf   :  { %v1451_v17 = vadd.f32 %v1449_v16, %v1441_v15 }
0x17d1   :  { %2998 = vtanh.f32 %v1451_v17 }
0x17db   :  { %v2999_v18 = vpop.eup %2998 }
0x17dc   :  { %1454 = vrot.lane.b32.xlu0 %v2999_v18, %s3045_s3 }
0x184e   :  { %v1455_v20 = vpop.permute.xlu0 %1454 }
0x184f   :  { %v1457_v21 = vmul.f32 %v1455_v20, %v1439_v26 }
0x1851   :  { %1459 = vrot.lane.b32.xlu1 %v1457_v21, %s3046_s16 }
0x18c3   :  { %v1460_v23 = vpop.permute.xlu1 %1459 }
0x18c4   :  { %1462 = vst.msk [vmem:[#allocation3] sm:$0xff] %vm198_vm3, %v1460_v23  ;;  %2730 = vmatmul.mubr.msk.f32.vlgmr.msra.gmra.mrb[32].mxu0 %vm198_vm3, %v1460_v23 }
0x18c5   :  { %2904 = vmatpush3.bf16.msra.mxu0 %v3402_v56  ;;  %2751 = vmatprep.mubr.msk.f32.mxu0 %vm3043_vm2, %v3044_v8 }
0x18c6   :  { %2905 = vmatprep.subr.bf16.mxu0 %v3042_v3 }
0x18c9   :  { %2907 = vmatpush3.bf16.msra.mxu0 %v3412_v28 }
0x18ca   :  { %2914 = vmatprep.subr.bf16.mxu0 %v3042_v3 }
0x1997   :  { %v1531_v24 = vpop.f32.mrb[32].mxu0 }
0x1998   :  { %v1535_v25 = vadd.f32 %v1531_v24, %v3437_v4  ;;  %v2731_v29 = vpop.f32.mrb[33].mxu0 }
0x199a   :  { %3000 = vtanh.f32 %v1535_v25  ;;  %v1536_v33 = vmul.f32 0.5, %v1535_v25 }
0x199c   :  { %3002 = vtanh.f32 %v1536_v33 }
0x19a4   :  { %v3001_v31 = vpop.eup %3000 }
0x19a5   :  { %1543 = vrot.lane.b32.xlu0 %v3001_v31, %s3045_s3 }
0x19a6   :  { %v3003_v35 = vpop.eup %3002 }
0x19a7   :  { %v1538_v37 = vadd.f32 1.0, %v3003_v35 }
0x19a9   :  { %v1539_v39 = vmul.f32 0.5, %v1538_v37 }
0x19ab   :  { %v1541_v42 = vmul.f32 %v1539_v39, %v1451_v17 }
0x1a17   :  { %v1544_v40 = vpop.permute.xlu0 %1543 }
0x1a18   :  { %v1546_v41 = vmul.f32 %v1544_v40, %v1539_v39 }
0x1a1a   :  { %1548 = vrot.lane.b32.xlu1 %v1546_v41, %s3046_s16 }
0x1a8c   :  { %v1549_v43 = vpop.permute.xlu1 %1548 }
0x1a8d   :  { %v1551_v22 = vadd.f32 %v1549_v43, %v1541_v42 }
0x1a8f   :  { %3004 = vtanh.f32 %v1551_v22 }
0x1a99   :  { %v3005_v44 = vpop.eup %3004 }
0x1a9a   :  { %1554 = vrot.lane.b32.xlu0 %v3005_v44, %s3045_s3 }
0x1b0c   :  { %v1555_v46 = vpop.permute.xlu0 %1554 }
0x1b0d   :  { %v1557_v47 = vmul.f32 %v1555_v46, %v1539_v39 }
0x1b0f   :  { %1559 = vrot.lane.b32.xlu1 %v1557_v47, %s3046_s16 }
0x1b81   :  { %v1560_v48 = vpop.permute.xlu1 %1559 }
0x1b82   :  { %1562 = vst.msk [vmem:[#allocation3 + $0x8] sm:$0xff] %vm198_vm3, %v1560_v48  ;;  %2741 = vmatmul.mubr.msk.f32.vlgmr.msra.gmra.mrb[24].mxu1 %vm198_vm3, %v1560_v48 }
0x1b83   :  { %2910 = vmatpush3.bf16.msra.mxu1 %v3402_v56  ;;  %2762 = vmatprep.mubr.msk.f32.mxu1 %vm3043_vm2, %v3044_v8 }
0x1b84   :  { %2911 = vmatprep.subr.bf16.mxu1 %v3042_v3 }
0x1b87   :  { %2913 = vmatpush3.bf16.msra.mxu1 %v3412_v28 }
0x1b88   :  { %2920 = vmatprep.subr.bf16.mxu1 %v3042_v3 }
0x1c55   :  { %v1631_v32 = vpop.f32.mrb[24].mxu1 }
0x1c56   :  { %v1635_v49 = vadd.f32 %v1631_v32, %v3437_v4  ;;  %v2742_v50 = vpop.f32.mrb[25].mxu1 }
0x1c58   :  { %3006 = vtanh.f32 %v1635_v49  ;;  %v1636_v52 = vmul.f32 0.5, %v1635_v49 }
0x1c5a   :  { %3008 = vtanh.f32 %v1636_v52 }
0x1c62   :  { %v3007_v51 = vpop.eup %3006 }
0x1c63   :  { %1643 = vrot.lane.b32.xlu0 %v3007_v51, %s3045_s3 }
0x1c64   :  { %v3009_v53 = vpop.eup %3008 }
0x1c65   :  { %v1638_v54 = vadd.f32 1.0, %v3009_v53 }
0x1c67   :  { %v1639_v55 = vmul.f32 0.5, %v1638_v54 }
0x1c69   :  { %v1641_v59 = vmul.f32 %v1639_v55, %v1551_v22 }
0x1cd5   :  { %v1644_v57 = vpop.permute.xlu0 %1643 }
0x1cd6   :  { %v1646_v58 = vmul.f32 %v1644_v57, %v1639_v55 }
0x1cd8   :  { %1648 = vrot.lane.b32.xlu1 %v1646_v58, %s3046_s16  ;;  %v2171_v58 = vld [vmem:[%s3644_s7] sm:$0xff] }
0x1d4a   :  { %v1649_v60 = vpop.permute.xlu1 %1648 }
0x1d4b   :  { %v1651_v61 = vadd.f32 %v1649_v60, %v1641_v59  ;;  %v2172_v59 = vld [vmem:[%s3644_s7 + $0x8] sm:$0xff] }
0x1d4c   :  { %v2932_v60 = vpack.c.bf16 %v2172_v59, %v2171_v58 }
0x1d4d   :  { %3010 = vtanh.f32 %v1651_v61 }
0x1d57   :  { %v3011_v62 = vpop.eup %3010 }
0x1d58   :  { %1654 = vrot.lane.b32.xlu0 %v3011_v62, %s3045_s3 }
0x1dca   :  { %v1655_v63 = vpop.permute.xlu0 %1654 }
0x1dcb   :  { %v1657_v0 = vmul.f32 %v1655_v63, %v1639_v55 }
0x1dcd   :  { %1659 = vrot.lane.b32.xlu1 %v1657_v0, %s3046_s16  ;;  %v2173_v0 = vld [vmem:[%s3644_s7 + $0x10] sm:$0xff] }
0x1e3f   :  { %v1660_v1 = vpop.permute.xlu1 %1659 }
0x1e40   :  { %1662 = vst.msk [vmem:[#allocation3 + $0x10] sm:$0xff] %vm198_vm3, %v1660_v1  ;;  %2752 = vmatmul.mubr.msk.f32.vlgmr.msra.gmra.mrb[34].mxu0 %vm198_vm3, %v1660_v1  ;;  %v2174_v1 = vld [vmem:[%s3644_s7 + $0x18] sm:$0xff] }
0x1e41   :  { %2916 = vmatpush3.bf16.msra.mxu0 %v3402_v56  ;;  %2773 = vmatprep.mubr.msk.f32.mxu0 %vm3043_vm2, %v3044_v8 }
0x1e42   :  { %2917 = vmatprep.subr.bf16.mxu0 %v3042_v3 }
0x1e45   :  { %2919 = vmatpush3.bf16.msra.mxu0 %v3412_v28 }
0x1e46   :  { %2926 = vmatprep.subr.bf16.mxu0 %v3042_v3 }
0x1f13   :  { %v1731_v2 = vpop.f32.mrb[34].mxu0 }
0x1f14   :  { %v1735_v7 = vadd.f32 %v1731_v2, %v3437_v4  ;;  %v2753_v5 = vpop.f32.mrb[35].mxu0  ;;  %v2936_v2 = vpack.c.bf16 %v2174_v1, %v2173_v0 }
0x1f15   :  { %v2163_v5 = vld [vmem:[#allocation3] sm:$0xff] }
0x1f16   :  { %3012 = vtanh.f32 %v1735_v7  ;;  %v1736_v9 = vmul.f32 0.5, %v1735_v7 }
0x1f18   :  { %3014 = vtanh.f32 %v1736_v9  ;;  %v2165_v9 = vld [vmem:[#allocation3 + $0x10] sm:$0xff] }
0x1f20   :  { %v3013_v6 = vpop.eup %3012 }
0x1f21   :  { %1743 = vrot.lane.b32.xlu0 %v3013_v6, %s3045_s3  ;;  %v2164_v6 = vld [vmem:[#allocation3 + $0x8] sm:$0xff] }
0x1f22   :  { %v3015_v12 = vpop.eup %3014 }
0x1f23   :  { %v1738_v10 = vadd.f32 1.0, %v3015_v12 }
0x1f25   :  { %v1739_v11 = vmul.f32 0.5, %v1738_v10 }
0x1f27   :  { %v1741_v14 = vmul.f32 %v1739_v11, %v1651_v61 }
0x1f93   :  { %v1744_v26 = vpop.permute.xlu0 %1743 }
0x1f94   :  { %v1746_v13 = vmul.f32 %v1744_v26, %v1739_v11 }
0x1f96   :  { %1748 = vrot.lane.b32.xlu1 %v1746_v13, %s3046_s16 }
0x2008   :  { %v1749_v15 = vpop.permute.xlu1 %1748 }
0x2009   :  { %v1751_v16 = vadd.f32 %v1749_v15, %v1741_v14  ;;  %v3534_v15 = vld [vmem:[%s3645_s8] ss:$0 sm:$0xff] }
0x200b   :  { %3016 = vtanh.f32 %v1751_v16 }
0x2015   :  { %v3017_v17 = vpop.eup %3016 }
0x2016   :  { %1754 = vrot.lane.b32.xlu0 %v3017_v17, %s3045_s3 }
0x2088   :  { %v1755_v18 = vpop.permute.xlu0 %1754 }
0x2089   :  { %v1757_v20 = vmul.f32 %v1755_v18, %v1739_v11 }
0x208b   :  { %1759 = vrot.lane.b32.xlu1 %v1757_v20, %s3046_s16 }
0x20fd   :  { %v1760_v21 = vpop.permute.xlu1 %1759 }
0x20fe   :  { %1762 = vst.msk [vmem:[#allocation3 + $0x18] sm:$0xff] %vm198_vm3, %v1760_v21  ;;  %2763 = vmatmul.mubr.msk.f32.vlgmr.msra.gmra.mrb[26].mxu1 %vm198_vm3, %v1760_v21 }
0x20ff   :  { %2922 = vmatpush3.bf16.msra.mxu1 %v3402_v56  ;;  %2784 = vmatprep.mubr.msk.f32.mxu1 %vm3043_vm2, %v3044_v8 }
0x2100   :  { %2923 = vmatprep.subr.bf16.mxu1 %v3042_v3 }
0x2103   :  { %2925 = vmatpush3.bf16.msra.mxu1 %v3412_v28 }
0x2104   :  { %2933 = vmatprep.subr.bf16.mxu1 %v2932_v60 }
0x2105   :  { %v2166_v12 = vld [vmem:[#allocation3 + $0x18] sm:$0xff] }
0x21d1   :  { %v1831_v23 = vpop.f32.mrb[26].mxu1 }
0x21d2   :  { %v1835_v24 = vadd.f32 %v1831_v23, %v3437_v4  ;;  %v2764_v25 = vpop.f32.mrb[27].mxu1 }
0x21d4   :  { %3018 = vtanh.f32 %v1835_v24  ;;  %v1836_v31 = vmul.f32 0.5, %v1835_v24 }
0x21d6   :  { %3020 = vtanh.f32 %v1836_v31 }
0x21de   :  { %v3019_v29 = vpop.eup %3018 }
0x21df   :  { %1843 = vrot.lane.b32.xlu0 %v3019_v29, %s3045_s3 }
0x21e0   :  { %v3021_v33 = vpop.eup %3020 }
0x21e1   :  { %v1838_v35 = vadd.f32 1.0, %v3021_v33 }
0x21e3   :  { %v1839_v37 = vmul.f32 0.5, %v1838_v35 }
0x21e5   :  { %v1841_v41 = vmul.f32 %v1839_v37, %v1751_v16 }
0x2251   :  { %v1844_v39 = vpop.permute.xlu0 %1843 }
0x2252   :  { %v1846_v40 = vmul.f32 %v1844_v39, %v1839_v37 }
0x2254   :  { %1848 = vrot.lane.b32.xlu1 %v1846_v40, %s3046_s16 }
0x22c6   :  { %v1849_v42 = vpop.permute.xlu1 %1848 }
0x22c7   :  { %v1851_v43 = vadd.f32 %v1849_v42, %v1841_v41 }
0x22c9   :  { %3022 = vtanh.f32 %v1851_v43 }
0x22d3   :  { %v3023_v22 = vpop.eup %3022 }
0x22d4   :  { %1854 = vrot.lane.b32.xlu0 %v3023_v22, %s3045_s3 }
0x2346   :  { %v1855_v44 = vpop.permute.xlu0 %1854 }
0x2347   :  { %v1857_v46 = vmul.f32 %v1855_v44, %v1839_v37 }
0x2349   :  { %1859 = vrot.lane.b32.xlu1 %v1857_v46, %s3046_s16 }
0x23bb   :  { %v1860_v47 = vpop.permute.xlu1 %1859 }
0x23bc   :  { %1862 = vst.msk [vmem:[#allocation3 + $0x20] sm:$0xff] %vm198_vm3, %v1860_v47  ;;  %2774 = vmatmul.mubr.msk.f32.vlgmr.msra.gmra.mrb[36].mxu0 %vm198_vm3, %v1860_v47 }
0x23bd   :  { %2928 = vmatpush3.bf16.msra.mxu0 %v3402_v56  ;;  %2795 = vmatprep.mubr.msk.f32.mxu0 %vm3043_vm2, %v3044_v8 }
0x23be   :  { %2929 = vmatprep.subr.bf16.mxu0 %v3042_v3 }
0x23c1   :  { %2931 = vmatpush3.bf16.msra.mxu0 %v3412_v28 }
0x23c3   :  { %v2167_v10 = vld [vmem:[#allocation3 + $0x20] sm:$0xff] }
0x248f   :  { %v1931_v48 = vpop.f32.mrb[36].mxu0 }
0x2490   :  { %v1935_v32 = vadd.f32 %v1931_v48, %v3437_v4  ;;  %v2775_v49 = vpop.f32.mrb[37].mxu0 }
0x2492   :  { %3024 = vtanh.f32 %v1935_v32  ;;  %v1936_v51 = vmul.f32 0.5, %v1935_v32 }
0x2494   :  { %3026 = vtanh.f32 %v1936_v51 }
0x249c   :  { %v3025_v50 = vpop.eup %3024 }
0x249d   :  { %1943 = vrot.lane.b32.xlu0 %v3025_v50, %s3045_s3 }
0x249e   :  { %v3027_v52 = vpop.eup %3026 }
0x249f   :  { %v1938_v53 = vadd.f32 1.0, %v3027_v52 }
0x24a1   :  { %v1939_v56 = vmul.f32 0.5, %v1938_v53 }
0x24a3   :  { %v1941_v3 = vmul.f32 %v1939_v56, %v1851_v43 }
0x250f   :  { %v1944_v54 = vpop.permute.xlu0 %1943 }
0x2510   :  { %v1946_v55 = vmul.f32 %v1944_v54, %v1939_v56 }
0x2512   :  { %1948 = vrot.lane.b32.xlu1 %v1946_v55, %s3046_s16 }
0x2584   :  { %v1949_v57 = vpop.permute.xlu1 %1948 }
0x2585   :  { %v3505_v28 = vadd.f32 %v1949_v57, %v1941_v3 }
0x2587   :  { %3028 = vtanh.f32 %v3505_v28 }
0x2591   :  { %v3029_v61 = vpop.eup %3028 }
0x2592   :  { %1954 = vrot.lane.b32.xlu0 %v3029_v61, %s3045_s3 }
0x2604   :  { %v1955_v62 = vpop.permute.xlu0 %1954 }
0x2605   :  { %v1957_v63 = vmul.f32 %v1955_v62, %v1939_v56 }
0x2607   :  { %1959 = vrot.lane.b32.xlu1 %v1957_v63, %s3046_s16 }
0x2679   :  { %v1960_v7 = vpop.permute.xlu1 %1959 }
0x267a   :  { %1962 = vst.msk [vmem:[#allocation3 + $0x28] sm:$0xff] %vm198_vm3, %v1960_v7  ;;  %2785 = vmatmul.mubr.msk.f32.vlgmr.msra.gmra.mrb[28].mxu1 %vm198_vm3, %v1960_v7 }
0x267b   :  { %2935 = vmatpush3.bf16.msra.mxu1 %v2932_v60  ;;  %2806 = vmatprep.mubr.msk.f32.mxu1 %vm198_vm3, %v2163_v5 }
0x267c   :  { %2937 = vmatprep.subr.bf16.mxu1 %v2936_v2 }
0x267f   :  { %2939 = vmatpush3.bf16.msra.mxu1 %v2936_v2 }
0x2681   :  { %v2168_v11 = vld [vmem:[#allocation3 + $0x28] sm:$0xff] }
0x2682   :  { %2807 = vmatmul.mubr.msk.f32.vlgmr.msra.gmra.mrb[30].mxu1 %vm198_vm3, %v2164_v6 }
0x2683   :  { %2809 = vmatprep.mubr.msk.f32.mxu1 %vm198_vm3, %v2165_v9 }
0x2686   :  { %2810 = vmatmul.mubr.msk.f32.gmra.mrb[32].mxu1 %vm198_vm3, %v2166_v12 }
0x2687   :  { %2812 = vmatprep.mubr.msk.f32.mxu1 %vm198_vm3, %v2167_v10 }
0x268a   :  { %2813 = vmatmul.mubr.msk.f32.gmra.mrb[34].mxu1 %vm198_vm3, %v2168_v11 }
0x274d   :  { %v2031_v26 = vpop.f32.mrb[28].mxu1 }
0x274e   :  { %v2035_v13 = vadd.f32 %v2031_v26, %v3437_v4  ;;  %v2786_v14 = vpop.f32.mrb[29].mxu1 }
0x2750   :  { %3030 = vtanh.f32 %v2035_v13  ;;  %v2036_v39 = vmul.f32 0.5, %v2035_v13 }
0x2752   :  { %3032 = vtanh.f32 %v2036_v39 }
0x2755   :  { %v2808_v16 = vpop.f32.mrb[30].mxu1 }
0x2756   :  { %v2278_v17 = vadd.f32 %v2808_v16, %v3534_v15  ;;  %v2272_v18 = vpop.f32.mrb[31].mxu1 }
0x2757   :  { %v2273_v20 = vadd.f32 %v3534_v15, %v2272_v18 }
0x2758   :  { %2312 = vst.msk [vmem:[%s3646_s13 + $0x8] sm:$0xff] %vm60_vm1, %v2278_v17 }
0x2759   :  { %2311 = vst.msk [vmem:[%s3646_s13] sm:$0xff] %vm60_vm1, %v2273_v20  ;;  %v2811_v21 = vpop.f32.mrb[32].mxu1 }
0x275a   :  { %v3031_v23 = vpop.eup %3030  ;;  %v2288_v24 = vadd.f32 %v2811_v21, %v3534_v15  ;;  %v2282_v25 = vpop.f32.mrb[33].mxu1 }
0x275b   :  { %v2283_v29 = vadd.f32 %v3534_v15, %v2282_v25  ;;  %2043 = vrot.lane.b32.xlu0 %v3031_v23, %s3045_s3 }
0x275c   :  { %2314 = vst.msk [vmem:[%s3646_s13 + $0x18] sm:$0xff] %vm60_vm1, %v2288_v24  ;;  %v3033_v40 = vpop.eup %3032 }
0x275d   :  { %2313 = vst.msk [vmem:[%s3646_s13 + $0x10] sm:$0xff] %vm60_vm1, %v2283_v29  ;;  %v2814_v31 = vpop.f32.mrb[34].mxu1  ;;  %v2038_v41 = vadd.f32 1.0, %v3033_v40 }
0x275e   :  { %v2298_v33 = vadd.f32 %v2814_v31, %v3534_v15  ;;  %v2292_v35 = vpop.f32.mrb[35].mxu1 }
0x275f   :  { %v2293_v37 = vadd.f32 %v3534_v15, %v2292_v35  ;;  %v2039_v42 = vmul.f32 0.5, %v2038_v41 }
0x2760   :  { %2316 = vst.msk [vmem:[%s3646_s13 + $0x28] sm:$0xff] %vm60_vm1, %v2298_v33 }
0x2761   :  { %2315 = vst.msk [vmem:[%s3646_s13 + $0x20] sm:$0xff] %vm60_vm1, %v2293_v37  ;;  %v2041_v44 = vmul.f32 %v2039_v42, %v3505_v28 }
0x27cd   :  { %v2044_v43 = vpop.permute.xlu0 %2043 }
0x27ce   :  { %v2046_v22 = vmul.f32 %v2044_v43, %v2039_v42 }
0x27d0   :  { %2048 = vrot.lane.b32.xlu1 %v2046_v22, %s3046_s16 }
0x2842   :  { %v2049_v46 = vpop.permute.xlu1 %2048 }
0x2843   :  { %v2051_v47 = vadd.f32 %v2049_v46, %v2041_v44 }
0x2845   :  { %3034 = vtanh.f32 %v2051_v47 }
0x284f   :  { %v3035_v48 = vpop.eup %3034 }
0x2850   :  { %2054 = vrot.lane.b32.xlu0 %v3035_v48, %s3045_s3 }
0x28c2   :  { %v2055_v32 = vpop.permute.xlu0 %2054 }
0x28c3   :  { %v2057_v49 = vmul.f32 %v2055_v32, %v2039_v42 }
0x28c5   :  { %2059 = vrot.lane.b32.xlu1 %v2057_v49, %s3046_s16 }
0x2937   :  { %v2060_v50 = vpop.permute.xlu1 %2059 }
0x2938   :  { %2062 = vst.msk [vmem:[#allocation3 + $0x30] sm:$0xff] %vm198_vm3, %v2060_v50  ;;  %2796 = vmatmul.mubr.msk.f32.vlgmr.msra.gmra.mrb[38].mxu0 %vm198_vm3, %v2060_v50 }
0x293f   :  { %v2169_v51 = vld [vmem:[#allocation3 + $0x30] sm:$0xff] }
0x2940   :  { %2815 = vmatprep.mubr.msk.f32.mxu1 %vm198_vm3, %v2169_v51 }
0x2a0b   :  { %v2131_v52 = vpop.f32.mrb[38].mxu0 }
0x2a0c   :  { %v2135_v53 = vadd.f32 %v2131_v52, %v3437_v4  ;;  %v2797_v56 = vpop.f32.mrb[39].mxu0  ;;  %v2385_v4 = vld [vmem:[%s3647_s12] ss:$0 sm:$0xff] }
0x2a0d   :  { %v1245_v0 = vadd.f32 %v2385_v4, %v3364_v19  ;;  %v1255_v1 = vadd.f32 %v2385_v4, %v3372_v30  ;;  %v1265_v2 = vadd.f32 %v2385_v4, %v3376_v36  ;;  %v1275_v7 = vadd.f32 %v2385_v4, %v3381_v45 }
0x2a0e   :  { %3036 = vtanh.f32 %v2135_v53  ;;  %v2136_v55 = vmul.f32 0.5, %v2135_v53  ;;  %v1250_v12 = vadd.f32 %v2385_v4, %v3366_v27  ;;  %v1260_v30 = vadd.f32 %v2385_v4, %v3374_v34 }
0x2a0f   :  { %v1270_v45 = vadd.f32 %v2385_v4, %v3378_v38 }
0x2a10   :  { %3038 = vtanh.f32 %v2136_v55 }
0x2a18   :  { %v3037_v54 = vpop.eup %3036 }
0x2a19   :  { %2143 = vrot.lane.b32.xlu0 %v3037_v54, %s3045_s3 }
0x2a1a   :  { %v3039_v3 = vpop.eup %3038 }
0x2a1b   :  { %v2138_v57 = vadd.f32 1.0, %v3039_v3 }
0x2a1d   :  { %v2139_v28 = vmul.f32 0.5, %v2138_v57 }
0x2a1f   :  { %v2141_v60 = vmul.f32 %v2139_v28, %v2051_v47 }
0x2a8b   :  { %v2144_v58 = vpop.permute.xlu0 %2143 }
0x2a8c   :  { %v2146_v59 = vmul.f32 %v2144_v58, %v2139_v28 }
0x2a8e   :  { %2148 = vrot.lane.b32.xlu1 %v2146_v59, %s3046_s16 }
0x2b00   :  { %v2149_v61 = vpop.permute.xlu1 %2148 }
0x2b01   :  { %v2151_v62 = vadd.f32 %v2149_v61, %v2141_v60 }
0x2b03   :  { %3040 = vtanh.f32 %v2151_v62 }
0x2b0d   :  { %v3041_v63 = vpop.eup %3040 }
0x2b0e   :  { %2154 = vrot.lane.b32.xlu0 %v3041_v63, %s3045_s3 }
0x2b12   :  { %2326 = vrot.lane.b32.xlu0 %v1245_v0, %s3047_s26 }
0x2b16   :  { %2330 = vrot.lane.b32.xlu0 %v1255_v1, %s3047_s26 }
0x2b1a   :  { %2334 = vrot.lane.b32.xlu0 %v1265_v2, %s3047_s26 }
0x2b1e   :  { %2338 = vrot.lane.b32.xlu0 %v1275_v7, %s3047_s26 }
0x2b80   :  { %v2155_v5 = vpop.permute.xlu0 %2154 }
0x2b81   :  { %v2157_v6 = vmul.f32 %v2155_v5, %v2139_v28 }
0x2b83   :  { %2159 = vrot.lane.b32.xlu1 %v2157_v6, %s3046_s16 }
0x2b84   :  { %v2327_v9 = vpop.permute.xlu0 %2326 }
0x2b85   :  { %2348 = vst.msk [vmem:[%s3646_s13] sm:$0xff] %vm2347_vm4, %v2327_v9 }
0x2b87   :  { %2328 = vrot.lane.b32.xlu1 %v1250_v12, %s3047_s26 }
0x2b88   :  { %v2331_v19 = vpop.permute.xlu0 %2330 }
0x2b89   :  { %2350 = vst.msk [vmem:[%s3646_s13 + $0x10] sm:$0xff] %vm2347_vm4, %v2331_v19 }
0x2b8b   :  { %2332 = vrot.lane.b32.xlu1 %v1260_v30, %s3047_s26 }
0x2b8c   :  { %v2335_v36 = vpop.permute.xlu0 %2334 }
0x2b8d   :  { %2352 = vst.msk [vmem:[%s3646_s13 + $0x20] sm:$0xff] %vm2347_vm4, %v2335_v36 }
0x2b8f   :  { %2336 = vrot.lane.b32.xlu1 %v1270_v45, %s3047_s26 }
0x2b90   :  { %v2339_v17 = vpop.permute.xlu0 %2338 }
0x2bf5   :  { %v2160_v27 = vpop.permute.xlu1 %2159 }
0x2bf6   :  { %2162 = vst.msk [vmem:[#allocation3 + $0x38] sm:$0xff] %vm198_vm3, %v2160_v27 }
0x2bf9   :  { %v2329_v10 = vpop.permute.xlu1 %2328 }
0x2bfa   :  { %2349 = vst.msk [vmem:[%s3646_s13 + $0x8] sm:$0xff] %vm2347_vm4, %v2329_v10 }
0x2bfd   :  { %v2333_v34 = vpop.permute.xlu1 %2332  ;;  %v2170_v11 = vld [vmem:[#allocation3 + $0x38] sm:$0xff] }
0x2bfe   :  { %2351 = vst.msk [vmem:[%s3646_s13 + $0x18] sm:$0xff] %vm2347_vm4, %v2333_v34  ;;  %2816 = vmatmul.mubr.msk.f32.gmra.mrb[36].mxu1 %vm198_vm3, %v2170_v11 }
0x2c01   :  { %v2337_v38 = vpop.permute.xlu1 %2336 }
0x2c02   :  { %2353 = vst.msk [vmem:[%s3646_s13 + $0x28] sm:$0xff] %vm2347_vm4, %v2337_v38 }
0x2cd1   :  { %v2817_v26 = vpop.f32.mrb[36].mxu1 }
0x2cd2   :  { %v2308_v13 = vadd.f32 %v2817_v26, %v3534_v15  ;;  %v2302_v14 = vpop.f32.mrb[37].mxu1 }
0x2cd3   :  { %v2303_v16 = vadd.f32 %v3534_v15, %v2302_v14 }
0x2cd4   :  { %2318 = vst.msk [vmem:[%s3646_s13 + $0x38] sm:$0xff] %vm60_vm1, %v2308_v13 }
0x2cd5   :  { %2355 = vst.msk [vmem:[%s3646_s13 + $0x38] sm:$0xff] %vm2347_vm4, %v3044_v8 }
0x2cd6   :  { %2317 = vst.msk [vmem:[%s3646_s13 + $0x30] sm:$0xff] %vm60_vm1, %v2303_v16 }
0x2cd7   :  { %2354 = vst.msk [vmem:[%s3646_s13 + $0x30] sm:$0xff] %vm2347_vm4, %v2339_v17 }

</bundles_post_ra>
